<compile_context>
chip_gen: v7x
topology: tpu7x:2x2x1
jax: 0.10.0
libtpu: 0.0.40
codegen_flags: <defaults>
</compile_context>

<pallas_src>
import functools

import jax
import jax.numpy as jnp
import numpy as np
from jax.experimental import pallas as pl
from jax.experimental.pallas import tpu as pltpu


def _round_up(x, m):
    return (x + m - 1) // m * m


def _pick_batch_tile(batch, cin_p, cout_p, hw, vmem_budget=8 * 2 ** 20, max_tile=8):
    """Images per grid step: as many as comfortably fit a VMEM budget."""
    per_image = (
        2 * cin_p * hw * 4                       # double-buffered input block
        + 2 * cout_p * hw * 4                    # double-buffered output block
        + cout_p * hw * 4                        # resident intermediate activation
        + max(cin_p, cout_p) * (hw + 256) * 4    # zero-padded halo staging row
        + 9 * (cin_p + cout_p) * hw * 2          # packed bf16 tap tensors
    )
    bt = max(1, min(batch, max_tile, vmem_budget // per_image))
    while batch % bt:                            # keep the grid exact
        bt -= 1
    return bt


# ---------------------------------------------------------------------------
# Fused kernel: (conv3x3 + folded BN + bias + ReLU) x 2 for bt images.
# ---------------------------------------------------------------------------
def _make_cvblock_kernel(H, W, bt, cin_p, cout_p):
    HW = H * W
    PAD = 128                                    # lane-aligned halo, >= W + 1
    assert W + 1 <= PAD, "row width exceeds the lane-aligned halo"

    def kernel(x_ref, w1_ref, b1_ref, w2_ref, b2_ref, o_ref):
        # x_ref : (bt, cin_p, HW)  f32   pixels on lanes, channels on sublanes
        # w1_ref: (cout_p, 9*cin_p)      packed folded conv1+BN1 weights
        # b1_ref: (cout_p, 1)      f32   folded conv1 bias
        # w2_ref: (cout_p, 9*cout_p)     packed folded conv2+BN2 weights
        # b2_ref: (cout_p, 1)      f32   folded conv2 bias
        # o_ref : (bt, cout_p, HW) f32
        mxu_dtype = w1_ref.dtype

        # Column-validity masks, generated in-kernel (no extra HBM input):
        # left taps are invalid at x == 0, right taps at x == W - 1.
        col = jax.lax.broadcasted_iota(jnp.int32, (1, HW), 1) % W
        mask_l = (col != 0).astype(jnp.float32)
        mask_r = (col != W - 1).astype(jnp.float32)

        def packed_taps(img):
            # img: (C, HW) one image -> im2col-packed (9*C, HW), tap-major.
            c = img.shape[0]
            halo = jnp.zeros((c, PAD), jnp.float32)
            row = jnp.concatenate([halo, img, halo], axis=1)   # (C, HW+2*PAD)
            wins = []
            for dy in range(3):
                for dx in range(3):
                    s = PAD + (dy - 1) * W + (dx - 1)
                    win = row[:, s:s + HW]        # shifted window, (C, HW)
                    if dx == 0:
                        win = win * mask_l        # kill wrap at x == 0
                    elif dx == 2:
                        win = win * mask_r        # kill wrap at x == W - 1
                    wins.append(win)
            # Sublane concat stays tile-aligned because C is a multiple of 8.
            return jnp.concatenate(wins, axis=0)  # (9*C, HW)

        def conv_bn_relu(imgs, w_ref, b_ref):
            # imgs: list of bt images, each (C, HW).  One MXU matmul per
            # stage: (cout_p, 9*C) @ (9*C, bt*HW), f32 accumulation.
            taps = jnp.concatenate([packed_taps(im) for im in imgs], axis=1)
            acc = jnp.dot(w_ref[...], taps.astype(mxu_dtype),
                          preferred_element_type=jnp.float32)
            return jnp.maximum(acc + b_ref[...], 0.0)          # (cout_p, bt*HW)

        x_imgs = [x_ref[b] for b in range(bt)]
        h = conv_bn_relu(x_imgs, w1_ref, b1_ref)               # conv1+bn1+relu1
        h_imgs = [h[:, b * HW:(b + 1) * HW] for b in range(bt)]
        y = conv_bn_relu(h_imgs, w2_ref, b2_ref)               # conv2+bn2+relu2
        for b in range(bt):
            o_ref[b] = y[:, b * HW:(b + 1) * HW].astype(o_ref.dtype)

    return kernel


# ---------------------------------------------------------------------------
# Host-side wrapper.
# ---------------------------------------------------------------------------
@functools.partial(jax.jit, static_argnames=("out_channels",))
def _cvblock_forward(x_nchw, w1k, b1c, w2k, b2c, *, out_channels):
    B, Cin, H, W = x_nchw.shape
    HW = H * W
    cout_p, k1 = w1k.shape
    cin_p = k1 // 9
    assert cin_p >= Cin and cout_p >= out_channels
    assert w2k.shape == (cout_p, 9 * cout_p)

    # Channel padding to a multiple of 8 keeps the in-kernel tap stacking
    # aligned to the f32 (8, 128) tiling (layout plumbing; tiny copy).
    x = x_nchw.astype(jnp.float32)
    if cin_p != Cin:
        x = jnp.pad(x, ((0, 0), (0, cin_p - Cin), (0, 0), (0, 0)))
    x = x.reshape(B, cin_p, HW)                  # free reshape of NCHW

    bt = _pick_batch_tile(B, cin_p, cout_p, HW)
    kernel = _make_cvblock_kernel(H, W, bt, cin_p, cout_p)

    y = pl.pallas_call(
        kernel,
        out_shape=jax.ShapeDtypeStruct((B, cout_p, HW), jnp.float32),
        grid=(B // bt,),
        in_specs=[
            pl.BlockSpec((bt, cin_p, HW), lambda i: (i, 0, 0)),
            # Weight/bias blocks have constant index maps; with the short grid
            # their extra pipeline buffer is negligible (pl.Buffered(1) could
            # shave a little VMEM on v7x).
            pl.BlockSpec(w1k.shape, lambda i: (0, 0)),
            pl.BlockSpec(b1c.shape, lambda i: (0, 0)),
            pl.BlockSpec(w2k.shape, lambda i: (0, 0)),
            pl.BlockSpec(b2c.shape, lambda i: (0, 0)),
        ],
        out_specs=pl.BlockSpec((bt, cout_p, HW), lambda i: (i, 0, 0)),
        compiler_params=pltpu.CompilerParams(
            dimension_semantics=("parallel",),
            vmem_limit_bytes=32 * 1024 * 1024),
    )(x, w1k, b1c, w2k, b2c)

    return y[:, :out_channels, :].reshape(B, out_channels, H, W)


def cvblock_forward(x_nchw, packed):
    return _cvblock_forward(
        x_nchw, packed["w1k"], packed["b1c"], packed["w2k"], packed["b2c"],
        out_channels=packed["out_channels"])


def prepare_cvblock_params(params, mxu_dtype=jnp.bfloat16):
    """Fold eval-mode BN + conv bias into the weights, zero-pad channels to a
    multiple of 8, pack to tap-major (cout_p, 9*cin_p) layout and cast the
    matmul operands to the MXU input dtype.  Runs once, outside the per-call
    jitted path."""
    cin = params["w1"].shape[2]
    cout = params["w1"].shape[3]
    cin_p, cout_p = _round_up(cin, 8), _round_up(cout, 8)

    def fold_pack(w, b, scale, shift, ci, ci_p, co, co_p):
        wf = w * scale                           # (3,3,ci,co) * (co,)
        bf = b * scale + shift                   # (co,)
        wf = jnp.pad(wf, ((0, 0), (0, 0), (0, ci_p - ci), (0, co_p - co)))
        bf = jnp.pad(bf, (0, co_p - co))
        # Column index = (dy*3 + dx) * ci_p + ci  -> matches the kernel's
        # tap-major stacking order.
        wk = jnp.transpose(wf, (3, 0, 1, 2)).reshape(co_p, 9 * ci_p)
        return wk.astype(mxu_dtype), bf.reshape(co_p, 1).astype(jnp.float32)

    w1k, b1c = fold_pack(params["w1"], params["b1"], params["s1"],
                         params["sh1"], cin, cin_p, cout, cout_p)
    w2k, b2c = fold_pack(params["w2"], params["b2"], params["s2"],
                         params["sh2"], cout, cout_p, cout, cout_p)
    return dict(w1k=w1k, b1c=b1c, w2k=w2k, b2c=b2c, out_channels=cout)


# ---------------------------------------------------------------------------
# CvBlock parameters (deterministic init).
# ---------------------------------------------------------------------------
def init_cvblock_params(key, in_ch, out_ch, eps=1e-5):
    ks = jax.random.split(key, 12)

    def conv_init(kw, kb, cin, cout):
        bound = 1.0 / np.sqrt(cin * 9.0)
        w = jax.random.uniform(kw, (3, 3, cin, cout), jnp.float32, -bound, bound)
        b = jax.random.uniform(kb, (cout,), jnp.float32, -bound, bound)
        return w, b

    def bn_init(kg, kb, km, kv, c):
        gamma = 1.0 + 0.1 * jax.random.normal(kg, (c,), jnp.float32)
        beta = 0.1 * jax.random.normal(kb, (c,), jnp.float32)
        mean = 0.1 * jax.random.normal(km, (c,), jnp.float32)
        var = 1.0 + 0.1 * jax.random.uniform(kv, (c,), jnp.float32)
        scale = gamma / jnp.sqrt(var + eps)
        shift = beta - mean * scale
        return scale, shift

    w1, b1 = conv_init(ks[0], ks[1], in_ch, out_ch)
    s1, sh1 = bn_init(ks[2], ks[3], ks[4], ks[5], out_ch)
    w2, b2 = conv_init(ks[6], ks[7], out_ch, out_ch)
    s2, sh2 = bn_init(ks[8], ks[9], ks[10], ks[11], out_ch)
    return dict(w1=w1, b1=b1, s1=s1, sh1=sh1, w2=w2, b2=b2, s2=s2, sh2=sh2)


# ---------------------------------------------------------------------------
# Pure-JAX reference (lax.conv, float32) for correctness checking.
# ---------------------------------------------------------------------------
def cvblock_reference(x_nchw, params):
    def step(x, w, b, sc, sh):
        w_oihw = jnp.transpose(w, (3, 2, 0, 1))  # (3,3,Cin,Cout) -> OIHW
        y = jax.lax.conv_general_dilated(
            x, w_oihw, window_strides=(1, 1), padding="SAME",
            dimension_numbers=("NCHW", "OIHW", "NCHW"))
        y = y + b[None, :, None, None]
        y = y * sc[None, :, None, None] + sh[None, :, None, None]
        return jnp.maximum(y, 0.0)

    x = step(x_nchw, params["w1"], params["b1"], params["s1"], params["sh1"])
    x = step(x, params["w2"], params["b2"], params["s2"], params["sh2"])
    return x


if __name__ == "__main__":
    key = jax.random.PRNGKey(0)
    k_x, k_p = jax.random.split(key)

    B, C_IN, C_OUT, H, W = 2, 4, 8, 16, 16
    x = jax.random.normal(k_x, (B, C_IN, H, W), jnp.float32)  # NCHW like PyTorch
    params = init_cvblock_params(k_p, C_IN, C_OUT)
    ref = cvblock_reference(x, params)

    # Strict-accuracy path (float32 MXU inputs).
    packed_f32 = prepare_cvblock_params(params, mxu_dtype=jnp.float32)
    out_f32 = jax.block_until_ready(cvblock_forward(x, packed_f32))
    assert out_f32.shape == (B, C_OUT, H, W), out_f32.shape
    assert jnp.allclose(out_f32, ref, atol=2e-4, rtol=2e-4), float(
        jnp.max(jnp.abs(out_f32 - ref)))

    # Fast path (bf16 MXU inputs, f32 accumulation) — default for v5e/v6e/v7x.
    # Tolerance sized for bf16 input quantisation (~2^-8 relative, K <= 72).
    packed_bf16 = prepare_cvblock_params(params, mxu_dtype=jnp.bfloat16)
    out_bf16 = jax.block_until_ready(cvblock_forward(x, packed_bf16))
    assert out_bf16.shape == (B, C_OUT, H, W), out_bf16.shape
    assert jnp.allclose(out_bf16, ref, atol=8e-2, rtol=2e-2), float(
        jnp.max(jnp.abs(out_bf16 - ref)))

    print("KERNEL_OK")
</pallas_src>

<mosaic_0001>
module attributes {stable_mosaic.version = 11 : i64} {
  func.func @kernel(%arg0: i32, %arg1: memref<2x8x256xf32, #tpu.memory_space<vmem>>, %arg2: memref<8x72xf32, #tpu.memory_space<vmem>>, %arg3: memref<8x1xf32, #tpu.memory_space<vmem>>, %arg4: memref<8x72xf32, #tpu.memory_space<vmem>>, %arg5: memref<8x1xf32, #tpu.memory_space<vmem>>, %arg6: memref<2x8x256xf32, #tpu.memory_space<vmem>>) attributes {dimension_semantics = [#tpu.dimension_semantics<parallel>], iteration_bounds = array<i64: 1>, scalar_prefetch = 0 : i64, scratch_operands = 0 : i64, tpu.core_type = #tpu.core_type<tc>, window_params = [{transform_indices = @transform_0, window_bounds = array<i64: 2, 8, 256>}, {pipeline_mode = #tpu.pipeline_mode<synchronous>, transform_indices = @transform_1, window_bounds = array<i64: 8, 72>}, {pipeline_mode = #tpu.pipeline_mode<synchronous>, transform_indices = @transform_2, window_bounds = array<i64: 8, 1>}, {pipeline_mode = #tpu.pipeline_mode<synchronous>, transform_indices = @transform_3, window_bounds = array<i64: 8, 72>}, {pipeline_mode = #tpu.pipeline_mode<synchronous>, transform_indices = @transform_4, window_bounds = array<i64: 8, 1>}, {transform_indices = @transform_5, window_bounds = array<i64: 2, 8, 256>}]} {
    %0 = tpu.iota {dimensions = array<i32: 1>} : vector<1x256xi32>
    %c16_i32 = arith.constant 16 : i32
    %c0_i32 = arith.constant 0 : i32
    %1 = arith.cmpi eq, %c16_i32, %c0_i32 : i32
    %c1_i32 = arith.constant 1 : i32
    %2 = arith.select %1, %c1_i32, %c16_i32 : i32
    %3 = vector.broadcast %2 : i32 to vector<1x256xi32>
    %4 = arith.remsi %0, %3 : vector<1x256xi32>
    %c0_i32_0 = arith.constant 0 : i32
    %5 = vector.broadcast %c0_i32_0 : i32 to vector<1x256xi32>
    %6 = arith.cmpi ne, %4, %5 : vector<1x256xi32>
    %c0_i32_1 = arith.constant 0 : i32
    %7 = vector.broadcast %c0_i32_1 : i32 to vector<1x256xi32>
    %8 = arith.cmpi slt, %4, %7 : vector<1x256xi32>
    %c0_i32_2 = arith.constant 0 : i32
    %9 = arith.cmpi slt, %2, %c0_i32_2 : i32
    %10 = vector.broadcast %9 : i1 to vector<1x256xi1>
    %11 = vector.broadcast %10 : vector<1x256xi1> to vector<1x256xi1>
    %12 = arith.xori %8, %11 : vector<1x256xi1>
    %13 = arith.andi %12, %6 : vector<1x256xi1>
    %14 = vector.broadcast %2 : i32 to vector<1x256xi32>
    %15 = arith.addi %4, %14 : vector<1x256xi32>
    %16 = arith.select %13, %15, %4 : vector<1x256xi1>, vector<1x256xi32>
    %c0_i32_3 = arith.constant 0 : i32
    %17 = vector.broadcast %c0_i32_3 : i32 to vector<1x256xi32>
    %18 = arith.cmpi ne, %16, %17 : vector<1x256xi32>
    %19 = arith.extui %18 : vector<1x256xi1> to vector<1x256xi32>
    %20 = arith.sitofp %19 : vector<1x256xi32> to vector<1x256xf32>
    %c15_i32 = arith.constant 15 : i32
    %21 = vector.broadcast %c15_i32 : i32 to vector<1x256xi32>
    %22 = arith.cmpi ne, %16, %21 : vector<1x256xi32>
    %23 = arith.extui %22 : vector<1x256xi1> to vector<1x256xi32>
    %24 = arith.sitofp %23 : vector<1x256xi32> to vector<1x256xf32>
    %c0 = arith.constant 0 : index
    %c0_4 = arith.constant 0 : index
    %c0_5 = arith.constant 0 : index
    %25 = vector.load %arg1[%c0, %c0_4, %c0_5] : memref<2x8x256xf32, #tpu.memory_space<vmem>>, vector<1x8x256xf32>
    %26 = vector.shape_cast %25 : vector<1x8x256xf32> to vector<8x256xf32>
    %c1 = arith.constant 1 : index
    %c0_6 = arith.constant 0 : index
    %c0_7 = arith.constant 0 : index
    %27 = vector.load %arg1[%c1, %c0_6, %c0_7] : memref<2x8x256xf32, #tpu.memory_space<vmem>>, vector<1x8x256xf32>
    %28 = vector.shape_cast %27 : vector<1x8x256xf32> to vector<8x256xf32>
    %cst = arith.constant 0.000000e+00 : f32
    %29 = vector.broadcast %cst : f32 to vector<8x128xf32>
    %30 = tpu.concatenate %29, %26, %29 in 1 : vector<8x128xf32>, vector<8x256xf32>, vector<8x128xf32> -> vector<8x512xf32>
    %31 = vector.extract_strided_slice %30 {offsets = [0, 111], sizes = [8, 256], strides = [1, 1]} : vector<8x512xf32> to vector<8x256xf32>
    %32 = vector.broadcast %20 : vector<1x256xf32> to vector<8x256xf32>
    %33 = arith.mulf %31, %32 : vector<8x256xf32>
    %34 = vector.extract_strided_slice %30 {offsets = [0, 112], sizes = [8, 256], strides = [1, 1]} : vector<8x512xf32> to vector<8x256xf32>
    %35 = vector.extract_strided_slice %30 {offsets = [0, 113], sizes = [8, 256], strides = [1, 1]} : vector<8x512xf32> to vector<8x256xf32>
    %36 = vector.broadcast %24 : vector<1x256xf32> to vector<8x256xf32>
    %37 = arith.mulf %35, %36 : vector<8x256xf32>
    %38 = vector.extract_strided_slice %30 {offsets = [0, 127], sizes = [8, 256], strides = [1, 1]} : vector<8x512xf32> to vector<8x256xf32>
    %39 = vector.broadcast %20 : vector<1x256xf32> to vector<8x256xf32>
    %40 = arith.mulf %38, %39 : vector<8x256xf32>
    %41 = vector.extract_strided_slice %30 {offsets = [0, 128], sizes = [8, 256], strides = [1, 1]} : vector<8x512xf32> to vector<8x256xf32>
    %42 = vector.extract_strided_slice %30 {offsets = [0, 129], sizes = [8, 256], strides = [1, 1]} : vector<8x512xf32> to vector<8x256xf32>
    %43 = vector.broadcast %24 : vector<1x256xf32> to vector<8x256xf32>
    %44 = arith.mulf %42, %43 : vector<8x256xf32>
    %45 = vector.extract_strided_slice %30 {offsets = [0, 143], sizes = [8, 256], strides = [1, 1]} : vector<8x512xf32> to vector<8x256xf32>
    %46 = vector.broadcast %20 : vector<1x256xf32> to vector<8x256xf32>
    %47 = arith.mulf %45, %46 : vector<8x256xf32>
    %48 = vector.extract_strided_slice %30 {offsets = [0, 144], sizes = [8, 256], strides = [1, 1]} : vector<8x512xf32> to vector<8x256xf32>
    %49 = vector.extract_strided_slice %30 {offsets = [0, 145], sizes = [8, 256], strides = [1, 1]} : vector<8x512xf32> to vector<8x256xf32>
    %50 = vector.broadcast %24 : vector<1x256xf32> to vector<8x256xf32>
    %51 = arith.mulf %49, %50 : vector<8x256xf32>
    %52 = tpu.concatenate %33, %34, %37, %40, %41, %44, %47, %48, %51 in 0 : vector<8x256xf32>, vector<8x256xf32>, vector<8x256xf32>, vector<8x256xf32>, vector<8x256xf32>, vector<8x256xf32>, vector<8x256xf32>, vector<8x256xf32>, vector<8x256xf32> -> vector<72x256xf32>
    %cst_8 = arith.constant 0.000000e+00 : f32
    %53 = vector.broadcast %cst_8 : f32 to vector<8x128xf32>
    %54 = tpu.concatenate %53, %28, %53 in 1 : vector<8x128xf32>, vector<8x256xf32>, vector<8x128xf32> -> vector<8x512xf32>
    %55 = vector.extract_strided_slice %54 {offsets = [0, 111], sizes = [8, 256], strides = [1, 1]} : vector<8x512xf32> to vector<8x256xf32>
    %56 = vector.broadcast %20 : vector<1x256xf32> to vector<8x256xf32>
    %57 = arith.mulf %55, %56 : vector<8x256xf32>
    %58 = vector.extract_strided_slice %54 {offsets = [0, 112], sizes = [8, 256], strides = [1, 1]} : vector<8x512xf32> to vector<8x256xf32>
    %59 = vector.extract_strided_slice %54 {offsets = [0, 113], sizes = [8, 256], strides = [1, 1]} : vector<8x512xf32> to vector<8x256xf32>
    %60 = vector.broadcast %24 : vector<1x256xf32> to vector<8x256xf32>
    %61 = arith.mulf %59, %60 : vector<8x256xf32>
    %62 = vector.extract_strided_slice %54 {offsets = [0, 127], sizes = [8, 256], strides = [1, 1]} : vector<8x512xf32> to vector<8x256xf32>
    %63 = vector.broadcast %20 : vector<1x256xf32> to vector<8x256xf32>
    %64 = arith.mulf %62, %63 : vector<8x256xf32>
    %65 = vector.extract_strided_slice %54 {offsets = [0, 128], sizes = [8, 256], strides = [1, 1]} : vector<8x512xf32> to vector<8x256xf32>
    %66 = vector.extract_strided_slice %54 {offsets = [0, 129], sizes = [8, 256], strides = [1, 1]} : vector<8x512xf32> to vector<8x256xf32>
    %67 = vector.broadcast %24 : vector<1x256xf32> to vector<8x256xf32>
    %68 = arith.mulf %66, %67 : vector<8x256xf32>
    %69 = vector.extract_strided_slice %54 {offsets = [0, 143], sizes = [8, 256], strides = [1, 1]} : vector<8x512xf32> to vector<8x256xf32>
    %70 = vector.broadcast %20 : vector<1x256xf32> to vector<8x256xf32>
    %71 = arith.mulf %69, %70 : vector<8x256xf32>
    %72 = vector.extract_strided_slice %54 {offsets = [0, 144], sizes = [8, 256], strides = [1, 1]} : vector<8x512xf32> to vector<8x256xf32>
    %73 = vector.extract_strided_slice %54 {offsets = [0, 145], sizes = [8, 256], strides = [1, 1]} : vector<8x512xf32> to vector<8x256xf32>
    %74 = vector.broadcast %24 : vector<1x256xf32> to vector<8x256xf32>
    %75 = arith.mulf %73, %74 : vector<8x256xf32>
    %76 = tpu.concatenate %57, %58, %61, %64, %65, %68, %71, %72, %75 in 0 : vector<8x256xf32>, vector<8x256xf32>, vector<8x256xf32>, vector<8x256xf32>, vector<8x256xf32>, vector<8x256xf32>, vector<8x256xf32>, vector<8x256xf32>, vector<8x256xf32> -> vector<72x256xf32>
    %77 = tpu.concatenate %52, %76 in 1 : vector<72x256xf32>, vector<72x256xf32> -> vector<72x512xf32>
    %c0_9 = arith.constant 0 : index
    %c0_10 = arith.constant 0 : index
    %78 = vector.load %arg2[%c0_9, %c0_10] : memref<8x72xf32, #tpu.memory_space<vmem>>, vector<8x72xf32>
    %cst_11 = arith.constant dense<0.000000e+00> : vector<8x512xf32>
    %79 = tpu.matmul %78, %77, %cst_11 {dimension_numbers = #tpu.dot_dimension_numbers<[1], [0], [0], [1], [0, 0, 1, 1], [], []>} : vector<8x72xf32>, vector<72x512xf32>, vector<8x512xf32> -> vector<8x512xf32>
    %c0_12 = arith.constant 0 : index
    %c0_13 = arith.constant 0 : index
    %80 = vector.load %arg3[%c0_12, %c0_13] : memref<8x1xf32, #tpu.memory_space<vmem>>, vector<8x1xf32>
    %81 = vector.broadcast %80 : vector<8x1xf32> to vector<8x512xf32>
    %82 = arith.addf %79, %81 : vector<8x512xf32>
    %cst_14 = arith.constant 0.000000e+00 : f32
    %83 = vector.broadcast %cst_14 : f32 to vector<8x512xf32>
    %84 = arith.maximumf %82, %83 : vector<8x512xf32>
    %85 = vector.extract_strided_slice %84 {offsets = [0, 0], sizes = [8, 256], strides = [1, 1]} : vector<8x512xf32> to vector<8x256xf32>
    %86 = vector.extract_strided_slice %84 {offsets = [0, 256], sizes = [8, 256], strides = [1, 1]} : vector<8x512xf32> to vector<8x256xf32>
    %cst_15 = arith.constant 0.000000e+00 : f32
    %87 = vector.broadcast %cst_15 : f32 to vector<8x128xf32>
    %88 = tpu.concatenate %87, %85, %87 in 1 : vector<8x128xf32>, vector<8x256xf32>, vector<8x128xf32> -> vector<8x512xf32>
    %89 = vector.extract_strided_slice %88 {offsets = [0, 111], sizes = [8, 256], strides = [1, 1]} : vector<8x512xf32> to vector<8x256xf32>
    %90 = vector.broadcast %20 : vector<1x256xf32> to vector<8x256xf32>
    %91 = arith.mulf %89, %90 : vector<8x256xf32>
    %92 = vector.extract_strided_slice %88 {offsets = [0, 112], sizes = [8, 256], strides = [1, 1]} : vector<8x512xf32> to vector<8x256xf32>
    %93 = vector.extract_strided_slice %88 {offsets = [0, 113], sizes = [8, 256], strides = [1, 1]} : vector<8x512xf32> to vector<8x256xf32>
    %94 = vector.broadcast %24 : vector<1x256xf32> to vector<8x256xf32>
    %95 = arith.mulf %93, %94 : vector<8x256xf32>
    %96 = vector.extract_strided_slice %88 {offsets = [0, 127], sizes = [8, 256], strides = [1, 1]} : vector<8x512xf32> to vector<8x256xf32>
    %97 = vector.broadcast %20 : vector<1x256xf32> to vector<8x256xf32>
    %98 = arith.mulf %96, %97 : vector<8x256xf32>
    %99 = vector.extract_strided_slice %88 {offsets = [0, 128], sizes = [8, 256], strides = [1, 1]} : vector<8x512xf32> to vector<8x256xf32>
    %100 = vector.extract_strided_slice %88 {offsets = [0, 129], sizes = [8, 256], strides = [1, 1]} : vector<8x512xf32> to vector<8x256xf32>
    %101 = vector.broadcast %24 : vector<1x256xf32> to vector<8x256xf32>
    %102 = arith.mulf %100, %101 : vector<8x256xf32>
    %103 = vector.extract_strided_slice %88 {offsets = [0, 143], sizes = [8, 256], strides = [1, 1]} : vector<8x512xf32> to vector<8x256xf32>
    %104 = vector.broadcast %20 : vector<1x256xf32> to vector<8x256xf32>
    %105 = arith.mulf %103, %104 : vector<8x256xf32>
    %106 = vector.extract_strided_slice %88 {offsets = [0, 144], sizes = [8, 256], strides = [1, 1]} : vector<8x512xf32> to vector<8x256xf32>
    %107 = vector.extract_strided_slice %88 {offsets = [0, 145], sizes = [8, 256], strides = [1, 1]} : vector<8x512xf32> to vector<8x256xf32>
    %108 = vector.broadcast %24 : vector<1x256xf32> to vector<8x256xf32>
    %109 = arith.mulf %107, %108 : vector<8x256xf32>
    %110 = tpu.concatenate %91, %92, %95, %98, %99, %102, %105, %106, %109 in 0 : vector<8x256xf32>, vector<8x256xf32>, vector<8x256xf32>, vector<8x256xf32>, vector<8x256xf32>, vector<8x256xf32>, vector<8x256xf32>, vector<8x256xf32>, vector<8x256xf32> -> vector<72x256xf32>
    %cst_16 = arith.constant 0.000000e+00 : f32
    %111 = vector.broadcast %cst_16 : f32 to vector<8x128xf32>
    %112 = tpu.concatenate %111, %86, %111 in 1 : vector<8x128xf32>, vector<8x256xf32>, vector<8x128xf32> -> vector<8x512xf32>
    %113 = vector.extract_strided_slice %112 {offsets = [0, 111], sizes = [8, 256], strides = [1, 1]} : vector<8x512xf32> to vector<8x256xf32>
    %114 = vector.broadcast %20 : vector<1x256xf32> to vector<8x256xf32>
    %115 = arith.mulf %113, %114 : vector<8x256xf32>
    %116 = vector.extract_strided_slice %112 {offsets = [0, 112], sizes = [8, 256], strides = [1, 1]} : vector<8x512xf32> to vector<8x256xf32>
    %117 = vector.extract_strided_slice %112 {offsets = [0, 113], sizes = [8, 256], strides = [1, 1]} : vector<8x512xf32> to vector<8x256xf32>
    %118 = vector.broadcast %24 : vector<1x256xf32> to vector<8x256xf32>
    %119 = arith.mulf %117, %118 : vector<8x256xf32>
    %120 = vector.extract_strided_slice %112 {offsets = [0, 127], sizes = [8, 256], strides = [1, 1]} : vector<8x512xf32> to vector<8x256xf32>
    %121 = vector.broadcast %20 : vector<1x256xf32> to vector<8x256xf32>
    %122 = arith.mulf %120, %121 : vector<8x256xf32>
    %123 = vector.extract_strided_slice %112 {offsets = [0, 128], sizes = [8, 256], strides = [1, 1]} : vector<8x512xf32> to vector<8x256xf32>
    %124 = vector.extract_strided_slice %112 {offsets = [0, 129], sizes = [8, 256], strides = [1, 1]} : vector<8x512xf32> to vector<8x256xf32>
    %125 = vector.broadcast %24 : vector<1x256xf32> to vector<8x256xf32>
    %126 = arith.mulf %124, %125 : vector<8x256xf32>
    %127 = vector.extract_strided_slice %112 {offsets = [0, 143], sizes = [8, 256], strides = [1, 1]} : vector<8x512xf32> to vector<8x256xf32>
    %128 = vector.broadcast %20 : vector<1x256xf32> to vector<8x256xf32>
    %129 = arith.mulf %127, %128 : vector<8x256xf32>
    %130 = vector.extract_strided_slice %112 {offsets = [0, 144], sizes = [8, 256], strides = [1, 1]} : vector<8x512xf32> to vector<8x256xf32>
    %131 = vector.extract_strided_slice %112 {offsets = [0, 145], sizes = [8, 256], strides = [1, 1]} : vector<8x512xf32> to vector<8x256xf32>
    %132 = vector.broadcast %24 : vector<1x256xf32> to vector<8x256xf32>
    %133 = arith.mulf %131, %132 : vector<8x256xf32>
    %134 = tpu.concatenate %115, %116, %119, %122, %123, %126, %129, %130, %133 in 0 : vector<8x256xf32>, vector<8x256xf32>, vector<8x256xf32>, vector<8x256xf32>, vector<8x256xf32>, vector<8x256xf32>, vector<8x256xf32>, vector<8x256xf32>, vector<8x256xf32> -> vector<72x256xf32>
    %135 = tpu.concatenate %110, %134 in 1 : vector<72x256xf32>, vector<72x256xf32> -> vector<72x512xf32>
    %c0_17 = arith.constant 0 : index
    %c0_18 = arith.constant 0 : index
    %136 = vector.load %arg4[%c0_17, %c0_18] : memref<8x72xf32, #tpu.memory_space<vmem>>, vector<8x72xf32>
    %cst_19 = arith.constant dense<0.000000e+00> : vector<8x512xf32>
    %137 = tpu.matmul %136, %135, %cst_19 {dimension_numbers = #tpu.dot_dimension_numbers<[1], [0], [0], [1], [0, 0, 1, 1], [], []>} : vector<8x72xf32>, vector<72x512xf32>, vector<8x512xf32> -> vector<8x512xf32>
    %c0_20 = arith.constant 0 : index
    %c0_21 = arith.constant 0 : index
    %138 = vector.load %arg5[%c0_20, %c0_21] : memref<8x1xf32, #tpu.memory_space<vmem>>, vector<8x1xf32>
    %139 = vector.broadcast %138 : vector<8x1xf32> to vector<8x512xf32>
    %140 = arith.addf %137, %139 : vector<8x512xf32>
    %cst_22 = arith.constant 0.000000e+00 : f32
    %141 = vector.broadcast %cst_22 : f32 to vector<8x512xf32>
    %142 = arith.maximumf %140, %141 : vector<8x512xf32>
    %143 = vector.extract_strided_slice %142 {offsets = [0, 0], sizes = [8, 256], strides = [1, 1]} : vector<8x512xf32> to vector<8x256xf32>
    %c0_23 = arith.constant 0 : index
    %c0_24 = arith.constant 0 : index
    %c0_25 = arith.constant 0 : index
    %144 = vector.load %arg6[%c0_23, %c0_24, %c0_25] : memref<2x8x256xf32, #tpu.memory_space<vmem>>, vector<1x8x256xf32>
    %145 = vector.shape_cast %144 : vector<1x8x256xf32> to vector<8x256xf32>
    %146 = vector.shape_cast %143 : vector<8x256xf32> to vector<1x8x256xf32>
    tpu.vector_store %arg6[%c0_23, %c0_24, %c0_25], %146 {strides = array<i32>} : memref<2x8x256xf32, #tpu.memory_space<vmem>>, vector<1x8x256xf32>,
    %147 = vector.extract_strided_slice %142 {offsets = [0, 256], sizes = [8, 256], strides = [1, 1]} : vector<8x512xf32> to vector<8x256xf32>
    %c1_26 = arith.constant 1 : index
    %c0_27 = arith.constant 0 : index
    %c0_28 = arith.constant 0 : index
    %148 = vector.load %arg6[%c1_26, %c0_27, %c0_28] : memref<2x8x256xf32, #tpu.memory_space<vmem>>, vector<1x8x256xf32>
    %149 = vector.shape_cast %148 : vector<1x8x256xf32> to vector<8x256xf32>
    %150 = vector.shape_cast %147 : vector<8x256xf32> to vector<1x8x256xf32>
    tpu.vector_store %arg6[%c1_26, %c0_27, %c0_28], %150 {strides = array<i32>} : memref<2x8x256xf32, #tpu.memory_space<vmem>>, vector<1x8x256xf32>,
    return
  }
  func.func @transform_0(%arg0: i32) -> (i32, i32, i32) {
    %c0_i32 = arith.constant 0 : i32
    %c0_i32_0 = arith.constant 0 : i32
    %c0_i32_1 = arith.constant 0 : i32
    return %arg0, %c0_i32, %c0_i32_0 : i32, i32, i32
  }
  func.func @transform_1(%arg0: i32) -> (i32, i32) {
    %c0_i32 = arith.constant 0 : i32
    %c0_i32_0 = arith.constant 0 : i32
    %c0_i32_1 = arith.constant 0 : i32
    return %c0_i32, %c0_i32_0 : i32, i32
  }
  func.func @transform_2(%arg0: i32) -> (i32, i32) {
    %c0_i32 = arith.constant 0 : i32
    %c0_i32_0 = arith.constant 0 : i32
    %c0_i32_1 = arith.constant 0 : i32
    return %c0_i32, %c0_i32_0 : i32, i32
  }
  func.func @transform_3(%arg0: i32) -> (i32, i32) {
    %c0_i32 = arith.constant 0 : i32
    %c0_i32_0 = arith.constant 0 : i32
    %c0_i32_1 = arith.constant 0 : i32
    return %c0_i32, %c0_i32_0 : i32, i32
  }
  func.func @transform_4(%arg0: i32) -> (i32, i32) {
    %c0_i32 = arith.constant 0 : i32
    %c0_i32_0 = arith.constant 0 : i32
    %c0_i32_1 = arith.constant 0 : i32
    return %c0_i32, %c0_i32_0 : i32, i32
  }
  func.func @transform_5(%arg0: i32) -> (i32, i32, i32) {
    %c0_i32 = arith.constant 0 : i32
    %c0_i32_0 = arith.constant 0 : i32
    %c0_i32_1 = arith.constant 0 : i32
    return %arg0, %c0_i32, %c0_i32_0 : i32, i32, i32
  }
}

</mosaic_0001>

<bundles_post_ra>
// kernel: _cvblock_forward.1
= control target key start
LH: loop header
LB: loop body
LE: loop exit
PB: predicated region body
PF: predicated region fallthrough
CT: control target
= control target key end

     0   :  { %v20_v0 = vlaneseq  ;;  %v1615_v1 = vmov 0.0   ;;  %s1616_s18 = smov 113   ;;  %s1617_s19 = smov 1   ;;  %vm84_vm4 = vcmask 924672   ;;  %vm96_vm5 = vcmask 1039360   ;;  %s2296_s0 = inlined_call_operand.vmem [shape: f32[2,8,256], index: 0, kind: input, shape index: {}]   ;;  %s2297_s2 = inlined_call_operand.vmem [shape: f32[8,1], index: 2, kind: input, shape index: {}]   ;;  %s2298_s1 = inlined_call_operand.vmem [shape: f32[8,72], index: 1, kind: input, shape index: {}]   ;;  %s2299_s4 = inlined_call_operand.vmem [shape: f32[8,1], index: 4, kind: input, shape index: {}]   ;;  %s2300_s3 = inlined_call_operand.vmem [shape: f32[8,72], index: 3, kind: input, shape index: {}]   ;;  %s2301_s5 = inlined_call_operand.vmem [shape: f32[2,8,256], index: 5, kind: output, shape index: {}]  }
   0x1   :  { %554 = vmatprep.mubr.f32.mxu0 %v1615_v1  ;;  %625 = vmatprep.mubr.f32.mxu1 %v1615_v1  ;;  %s1618_s20 = smov 127   ;;  %s1619_s21 = smov 15   ;;  %v1669_v12 = vld [vmem:[%s2296_s0] sm:$0xff]  ;;  %v1674_v13 = vld [vmem:[%s2296_s0 + $0x8] sm:$0xff]  ;;  %v1679_v14 = vld [vmem:[%s2296_s0 + $0x10] sm:$0xff]  ;;  %vm108_vm6 = vcmask 7168  }
   0x2   :  { %v21_v2 = vand.u32 127, %v20_v0  ;;  %v1684_v15 = vld [vmem:[%s2296_s0 + $0x18] sm:$0xff]  ;;  %s1620_s30 = smov 17   ;;  %v1238_v16 = vpack.i.bf16 %v1674_v13, %v1669_v12  ;;  %s1621_s6 = smov 111   ;;  %v1268_v18 = vpack.i.bf16 %v1679_v14, %v1615_v1  ;;  %vm120_vm7 = vcmask 121856  }
   0x3   :  { %v1248_v17 = vpack.i.bf16 %v1684_v15, %v1679_v14  ;;  %s1622_s0 = smov 95   ;;  %s1623_s7 = smov 126   ;;  %vm132_vm8 = vcmask 138240   ;;  %vm70_vm9 = vcmask 908288   ;;  %vm172_vm10 = vcmask 916480  }
   0x4   :  { %v22_v3 = vadd.s32 128, %v21_v2  ;;  %v27_v4 = vand.u32 15, %v21_v2  ;;  %s1624_s8 = smov 110   ;;  %s1625_s9 = smov 112   ;;  %vm210_vm11 = vcmask 777216   ;;  %vm160_vm12 = vcmask 1031168  }
   0x5   :  { %s1626_s10 = smov 96   ;;  %s1627_s11 = smov 94   ;;  %vm189_vm13 = vcmask 900096   ;;  %vm201_vm14 = vcmask 785408   ;;  %vm222_vm15 = vcmask 769024  }
   0x6   :  { %v34_v5 = vand.u32 15, %v22_v3  ;;  %vm53_vm0 = vcmp.ne.s32.totalorder %v27_v4, 15  ;;  %vm47_vm1 = vcmp.ne.s32.totalorder %v27_v4, 0 }
   0x7   :  { %v1125_v6 = vsel %vm53_vm0, 1.0, %v1615_v1  ;;  %v1123_v8 = vsel %vm47_vm1, 1.0, %v1615_v1  ;;  %vm486_vm0 = vcmask 588800  }
   0x8   :  { %vm54_vm2 = vcmp.ne.s32.totalorder %v34_v5, 15  ;;  %vm48_vm3 = vcmp.ne.s32.totalorder %v34_v5, 0 }
   0x9   :  { %v1126_v7 = vsel %vm54_vm2, 1.0, %v1615_v1  ;;  %v1124_v9 = vsel %vm48_vm3, 1.0, %v1615_v1 }
   0xa   :  { %v1213_v10 = vpack.i.bf16 %v1126_v7, %v1125_v6  ;;  %v1218_v11 = vpack.i.bf16 %v1124_v9, %v1123_v8 }
   0xc   :  { %1214 = vrot.lane.b32.xlu0 %v1213_v10, %s1616_s18  ;;  %1224 = vrot.lane.b32.xlu1 %v1213_v10, %s1617_s19 }
  0x10   :  { %1219 = vrot.lane.b32.xlu0 %v1218_v11, %s1618_s20  ;;  %1229 = vrot.lane.b32.xlu1 %v1218_v11, %s1619_s21 }
  0x14   :  { %1234 = vrot.lane.b32.xlu0 %v1213_v10, %s1620_s30  ;;  %1244 = vrot.lane.b32.xlu1 %v1218_v11, %s1621_s6 }
  0x18   :  { %1239 = vrot.lane.b32.xlu0 %v1238_v16, %s1618_s20  ;;  %1249 = vrot.lane.b32.xlu1 %v1248_v17, %s1618_s20 }
  0x1c   :  { %143 = vrot.lane.b32.xlu0 %v1615_v1, %s1618_s20  ;;  %1254 = vrot.lane.b32.xlu1 %v1238_v16, %s1621_s6 }
  0x20   :  { %1259 = vrot.lane.b32.xlu0 %v1248_v17, %s1621_s6  ;;  %1269 = vrot.lane.b32.xlu1 %v1268_v18, %s1622_s0 }
  0x24   :  { %1264 = vrot.lane.b32.xlu0 %v1238_v16, %s1622_s0 }
  0x7e   :  { %v1215_v19 = vpop.permute.xlu0 %1214  ;;  %v1225_v20 = vpop.permute.xlu1 %1224 }
  0x7f   :  { %v1216_v21 = vunpack.i.l.bf16 %v1215_v19  ;;  %v1227_v22 = vunpack.i.h.bf16 %v1225_v20  ;;  %v1702_v23 = vunpack.i.l.bf16 %v1225_v20  ;;  %v1704_v24 = vunpack.i.h.bf16 %v1215_v19 }
  0x81   :  { %v115_v25 = vmul.f32 0.0, %v1227_v22  ;;  %v89_v26 = vmul.f32 0.0, %v1216_v21  ;;  %v231_v29 = vmul.f32 %v1702_v23, %v1679_v14  ;;  %v1714_v35 = vsel %vm84_vm4, %v1216_v21, %v1704_v24 }
  0x82   :  { %v1220_v27 = vpop.permute.xlu0 %1219  ;;  %v1230_v28 = vpop.permute.xlu1 %1229  ;;  %v90_v44 = vmul.f32 %v1714_v35, %v1669_v12  ;;  %v91_v45 = vmul.f32 %v1704_v24, %v1674_v13  ;;  %v1737_v48 = vsel %vm108_vm6, %v1702_v23, %v1227_v22  ;;  %v113_v51 = vmul.f32 %v1702_v23, %v1669_v12 }
  0x83   :  { %v1708_v30 = vunpack.i.h.bf16 %v1220_v27  ;;  %v1221_v31 = vunpack.i.l.bf16 %v1220_v27  ;;  %154 = vrot.lane.b32.xlu1 %v89_v26, %s1623_s7  ;;  %v1232_v32 = vunpack.i.h.bf16 %v1230_v28  ;;  %v1711_v33 = vunpack.i.l.bf16 %v1230_v28 }
  0x84   :  { %v1273_v34 = vpack.i.bf16 %v231_v29, %v115_v25  ;;  %v1283_v49 = vpack.i.bf16 %v91_v45, %v90_v44  ;;  %v114_v53 = vmul.f32 %v1737_v48, %v1674_v13  ;;  %v227_v54 = vmul.f32 %v1679_v14, %v1714_v35 }
  0x85   :  { %v1718_v36 = vsel %vm96_vm5, %v1221_v31, %v1708_v30  ;;  %v127_v37 = vmul.f32 0.0, %v1232_v32  ;;  %v101_v38 = vmul.f32 0.0, %v1221_v31  ;;  %v233_v39 = vmul.f32 %v1711_v33, %v1679_v14 }
  0x86   :  { %v102_v40 = vmul.f32 %v1718_v36, %v1669_v12  ;;  %v103_v41 = vmul.f32 %v1708_v30, %v1674_v13  ;;  %v229_v46 = vmul.f32 %v1679_v14, %v1718_v36  ;;  %v230_v47 = vmul.f32 %v1708_v30, %v1684_v15  ;;  %v1235_v50 = vpop.permute.xlu0 %1234  ;;  %v1245_v2 = vpop.permute.xlu1 %1244 }
  0x87   :  { %1274 = vrot.lane.b32.xlu1 %v1273_v34, %s1624_s8  ;;  %166 = vrot.lane.b32.xlu0 %v101_v38, %s1625_s9  ;;  %v1278_v42 = vpack.i.bf16 %v233_v39, %v127_v37  ;;  %v228_v55 = vmul.f32 %v1704_v24, %v1684_v15  ;;  %v1751_v56 = vunpack.i.l.bf16 %v1235_v50  ;;  %v1303_v57 = vpack.i.bf16 %v114_v53, %v113_v51 }
  0x88   :  { %v1288_v43 = vpack.i.bf16 %v103_v41, %v102_v40  ;;  %v1298_v52 = vpack.i.bf16 %v230_v47, %v229_v46  ;;  %v1754_v59 = vsel %vm120_vm7, %v1711_v33, %v1232_v32  ;;  %v232_v61 = vmul.f32 %v1684_v15, %v1737_v48 }
  0x89   :  { %v1293_v58 = vpack.i.bf16 %v228_v55, %v227_v54  ;;  %v137_v60 = vmul.f32 %v1751_v56, %v1669_v12  ;;  %v125_v62 = vmul.f32 %v1711_v33, %v1669_v12  ;;  %v126_v63 = vmul.f32 %v1754_v59, %v1674_v13 }
  0x8a   :  { %v1240_v0 = vpop.permute.xlu0 %1239  ;;  %v1237_v4 = vunpack.i.h.bf16 %v1235_v50  ;;  %v1246_v5 = vunpack.i.l.bf16 %v1245_v2  ;;  %v1771_v7 = vunpack.i.h.bf16 %v1245_v2  ;;  %v234_v8 = vmul.f32 %v1684_v15, %v1754_v59  ;;  %v1793_v22 = vpop.permute.xlu1 %1249 }
  0x8b   :  { %1279 = vrot.lane.b32.xlu1 %v1278_v42, %s1626_s10  ;;  %1289 = vrot.lane.b32.xlu0 %v1288_v43, %s1625_s9  ;;  %v1308_v3 = vpack.i.bf16 %v126_v63, %v125_v62  ;;  %v1241_v6 = vunpack.i.l.bf16 %v1240_v0  ;;  %v235_v9 = vmul.f32 %v1751_v56, %v1679_v14  ;;  %v1242_v16 = vunpack.i.h.bf16 %v1240_v0 }
  0x8c   :  { %v1781_v11 = vsel %vm132_vm8, %v1751_v56, %v1237_v4  ;;  %v75_v17 = vmul.f32 0.0, %v1246_v5  ;;  %v1787_v18 = vsel %vm70_vm9, %v1246_v5, %v1771_v7  ;;  %v139_v20 = vmul.f32 0.0, %v1237_v4 }
  0x8d   :  { %v138_v21 = vmul.f32 %v1781_v11, %v1674_v13  ;;  %v150_v25 = vsel %vm96_vm5, %v1241_v6, %v1242_v16  ;;  %v76_v27 = vmul.f32 %v1787_v18, %v1669_v12  ;;  %v77_v28 = vmul.f32 %v1771_v7, %v1674_v13 }
  0x8e   :  { %v1777_v10 = vpop.permute.xlu0 %143  ;;  %v1252_v29 = vunpack.i.h.bf16 %v1793_v22  ;;  %v1251_v31 = vunpack.i.l.bf16 %v1793_v22  ;;  %v236_v32 = vmul.f32 %v1684_v15, %v1781_v11  ;;  %v1313_v34 = vpack.i.bf16 %v1242_v16, %v150_v25  ;;  %v1806_v37 = vpop.permute.xlu1 %1254 }
  0x8f   :  { %1299 = vrot.lane.b32.xlu0 %v1298_v52, %s1625_s9  ;;  %1284 = vrot.lane.b32.xlu1 %v1283_v49, %s1623_s7  ;;  %v149_v19 = vsel %vm96_vm5, %v1777_v10, %v1241_v6  ;;  %v1328_v38 = vpack.i.bf16 %v77_v28, %v76_v27  ;;  %v225_v12 = vmul.f32 %v1679_v14, %v1787_v18 }
  0x90   :  { %v1323_v26 = vpack.i.bf16 %v149_v19, %v75_v17  ;;  %v226_v13 = vmul.f32 %v1771_v7, %v1684_v15  ;;  %v244_v39 = vsel %vm96_vm5, %v1251_v31, %v1252_v29 }
  0x91   :  { %v1318_v40 = vpack.i.bf16 %v1252_v29, %v244_v39 }
  0x92   :  { %v1333_v41 = vpack.i.bf16 %v226_v13, %v225_v12  ;;  %v1819_v42 = vpop.permute.xlu1 %1269 }
  0x93   :  { %1304 = vrot.lane.b32.xlu0 %v1303_v57, %s1624_s8  ;;  %1294 = vrot.lane.b32.xlu1 %v1293_v58, %s1623_s7  ;;  %v1272_v14 = vunpack.i.h.bf16 %v1819_v42  ;;  %v1855_v2 = vunpack.i.l.bf16 %v1819_v42 }
  0x97   :  { %216 = vrot.lane.b32.xlu0 %v137_v60, %s1627_s11  ;;  %270 = vrot.lane.b32.xlu1 %v232_v61, %s1624_s8 }
  0x9b   :  { %1309 = vrot.lane.b32.xlu0 %v1308_v3, %s1626_s10  ;;  %284 = vrot.lane.b32.xlu1 %v1684_v15, %s1622_s0  ;;  %v1827_v15 = vpop.permute.xlu0 %1259 }
  0x9c   :  { %v1261_v54 = vunpack.i.l.bf16 %v1827_v15 }
  0x9f   :  { %278 = vrot.lane.b32.xlu0 %v234_v8, %s1626_s10  ;;  %290 = vrot.lane.b32.xlu1 %v235_v9, %s1627_s11  ;;  %v1829_v43 = vpop.permute.xlu0 %1264 }
  0xa0   :  { %v1266_v62 = vunpack.i.l.bf16 %v1829_v43 }
  0xa3   :  { %220 = vrot.lane.b32.xlu0 %v139_v20, %s1627_s11  ;;  %218 = vrot.lane.b32.xlu1 %v138_v21, %s1627_s11 }
  0xa7   :  { %292 = vrot.lane.b32.xlu0 %v236_v32, %s1627_s11  ;;  %1324 = vrot.lane.b32.xlu1 %v1323_v26, %s1620_s30 }
  0xab   :  { %1314 = vrot.lane.b32.xlu0 %v1313_v34, %s1620_s30  ;;  %1329 = vrot.lane.b32.xlu1 %v1328_v38, %s1620_s30  ;;  %v243_v38 = vsel %vm96_vm5, %v1777_v10, %v1251_v31 }
  0xaf   :  { %1319 = vrot.lane.b32.xlu0 %v1318_v40, %s1620_s30  ;;  %1334 = vrot.lane.b32.xlu1 %v1333_v41, %s1620_s30 }
  0xb3   :  { %431 = vrot.lane.b32.xlu0 %v1272_v14, %s1620_s30 }
  0xf5   :  { %v1831_v44 = vpop.permute.xlu1 %154 }
  0xf9   :  { %v1833_v45 = vpop.permute.xlu1 %1274  ;;  %v1835_v46 = vpop.permute.xlu0 %166 }
  0xfd   :  { %v1837_v47 = vpop.permute.xlu1 %1279  ;;  %v1290_v49 = vpop.permute.xlu0 %1289 }
  0xfe   :  { %v1282_v57 = vunpack.i.h.bf16 %v1837_v47  ;;  %v1292_v63 = vunpack.i.h.bf16 %v1290_v49  ;;  %v1291_v0 = vunpack.i.l.bf16 %v1290_v49 }
 0x100   :  { %v1348_v3 = vpack.i.bf16 %v1282_v57, %v1266_v62  ;;  %v174_v20 = vsel %vm172_vm10, %v1291_v0, %v1292_v63  ;;  %v173_v22 = vsel %vm172_vm10, %v1835_v46, %v1291_v0 }
 0x101   :  { %v1839_v50 = vpop.permute.xlu0 %1299  ;;  %v1285_v51 = vpop.permute.xlu1 %1284 }
 0x102   :  { %v1287_v4 = vunpack.i.h.bf16 %v1285_v51  ;;  %v1286_v5 = vunpack.i.l.bf16 %v1285_v51  ;;  %v1302_v17 = vunpack.i.h.bf16 %v1839_v50  ;;  %v1301_v19 = vunpack.i.l.bf16 %v1839_v50 }
 0x104   :  { %v1358_v21 = vpack.i.bf16 %v174_v20, %v1287_v4  ;;  %v162_v32 = vsel %vm160_vm12, %v1286_v5, %v1287_v4  ;;  %v260_v34 = vsel %vm172_vm10, %v1301_v19, %v1302_v17  ;;  %v1277_v20 = vunpack.i.h.bf16 %v1833_v45 }
 0x105   :  { %v1841_v52 = vpop.permute.xlu0 %1304  ;;  %v1295_v53 = vpop.permute.xlu1 %1294  ;;  %v1353_v13 = vpack.i.bf16 %v162_v32, %v243_v38  ;;  %v259_v0 = vsel %vm172_vm10, %v1835_v46, %v1301_v19 }
 0x106   :  { %v1306_v55 = vunpack.i.l.bf16 %v1841_v52  ;;  %v1297_v25 = vunpack.i.h.bf16 %v1295_v53  ;;  %v1296_v27 = vunpack.i.l.bf16 %v1295_v53  ;;  %v1307_v39 = vunpack.i.h.bf16 %v1841_v52 }
 0x107   :  { %v161_v52 = vsel %vm160_vm12, %v1831_v44, %v1286_v5  ;;  %v1257_v53 = vunpack.i.h.bf16 %v1806_v37 }
 0x108   :  { %v1338_v58 = vpack.i.bf16 %v1261_v54, %v1306_v55  ;;  %v1368_v12 = vpack.i.bf16 %v260_v34, %v1297_v25  ;;  %v252_v49 = vsel %vm160_vm12, %v1296_v27, %v1297_v25  ;;  %v251_v50 = vsel %vm160_vm12, %v1831_v44, %v1296_v27 }
 0x109   :  { %v1848_v60 = vpop.permute.xlu0 %216  ;;  %v1850_v61 = vpop.permute.xlu1 %270  ;;  %v1363_v31 = vpack.i.bf16 %v252_v49, %v1292_v63  ;;  %v1378_v51 = vpack.i.bf16 %v251_v50, %v173_v22  ;;  %v190_v4 = vsel %vm189_vm13, %v1306_v55, %v1307_v39  ;;  %v1373_v63 = vpack.i.bf16 %v161_v52, %v1302_v17 }
 0x10a   :  { %1339 = vrot.lane.b32.xlu1 %v1338_v58, %s1620_s30  ;;  %v1256_v58 = vunpack.i.l.bf16 %v1806_v37  ;;  %v272_v37 = vsel %vm189_vm13, %v1277_v20, %v1850_v61  ;;  %v1388_v5 = vpack.i.bf16 %v190_v4, %v1257_v53  ;;  %v1262_v25 = vunpack.i.h.bf16 %v1827_v15 }
 0x10b   :  { %v1924_v49 = vunpack.i.l.bf16 %v1833_v45  ;;  %v1927_v50 = vunpack.i.l.bf16 %v1837_v47  ;;  %v1628_v47 = vmov 0  }
 0x10c   :  { %v179_v17 = vsel %vm70_vm9, %v1256_v58, %v1257_v53  ;;  %v1398_v22 = vpack.i.bf16 %v272_v37, %v1262_v25  ;;  %1428 = vset.pattern.permute.xlu1 %v1628_v47  ;;  %1614 = vset.pattern.permute.xlu0 %v1628_v47 }
 0x10d   :  { %v1861_v6 = vpop.permute.xlu0 %1309  ;;  %v1863_v8 = vpop.permute.xlu1 %284 }
 0x10e   :  { %v1311_v9 = vunpack.i.l.bf16 %v1861_v6  ;;  %v287_v16 = vsel %vm210_vm11, %v1863_v8, %v1855_v2  ;;  %1349 = vrot.lane.b32.xlu1 %v1348_v3, %s1620_s30  ;;  %v1312_v27 = vunpack.i.h.bf16 %v1861_v6 }
 0x110   :  { %v1343_v26 = vpack.i.bf16 %v1311_v9, %v287_v16 }
 0x111   :  { %v1875_v28 = vpop.permute.xlu0 %278  ;;  %v1877_v29 = vpop.permute.xlu1 %290 }
 0x112   :  { %1344 = vrot.lane.b32.xlu0 %v1343_v26, %s1620_s30  ;;  %1359 = vrot.lane.b32.xlu1 %v1358_v21, %s1620_s30  ;;  %v1267_v26 = vunpack.i.h.bf16 %v1829_v43  ;;  %v281_v15 = vsel %vm201_vm14, %v1875_v28, %v1927_v50  ;;  %v286_v43 = vsel %vm210_vm11, %v1272_v14, %v1863_v8  ;;  %v280_v42 = vsel %vm201_vm14, %v1282_v57, %v1875_v28 }
 0x114   :  { %v212_v6 = vsel %vm210_vm11, %v1267_v26, %v1855_v2 }
 0x115   :  { %v1888_v40 = vpop.permute.xlu0 %220  ;;  %v1890_v41 = vpop.permute.xlu1 %218  ;;  %v1418_v8 = vpack.i.bf16 %v280_v42, %v212_v6 }
 0x116   :  { %1354 = vrot.lane.b32.xlu0 %v1353_v13, %s1620_s30  ;;  %1369 = vrot.lane.b32.xlu1 %v1368_v12, %s1620_s30  ;;  %v223_v14 = vsel %vm222_vm15, %v1848_v60, %v1890_v41  ;;  %v224_v57 = vsel %vm222_vm15, %v1890_v41, %v1888_v40 }
 0x119   :  { %v1903_v3 = vpop.permute.xlu0 %292  ;;  %v1325_v16 = vpop.permute.xlu1 %1324 }
 0x11a   :  { %1364 = vrot.lane.b32.xlu0 %v1363_v31, %s1620_s30  ;;  %1379 = vrot.lane.b32.xlu1 %v1378_v51, %s1620_s30  ;;  %v1327_v21 = vunpack.i.h.bf16 %v1325_v16  ;;  %v1915_v55 = vunpack.i.l.bf16 %v1325_v16  ;;  %v1383_v31 = vpack.i.bf16 %v179_v17, %v259_v0  ;;  %v191_v16 = vsel %vm189_vm13, %v1307_v39, %v1924_v49 }
 0x11b   :  { %v294_v45 = vsel %vm222_vm15, %v1877_v29, %v1903_v3  ;;  %v295_v28 = vsel %vm222_vm15, %v1903_v3, %v1888_v40 }
 0x11d   :  { %v1315_v32 = vpop.permute.xlu0 %1314  ;;  %v1330_v34 = vpop.permute.xlu1 %1329 }
 0x11e   :  { %1374 = vrot.lane.b32.xlu0 %v1373_v63, %s1620_s30  ;;  %1389 = vrot.lane.b32.xlu1 %v1388_v5, %s1620_s30  ;;  %v1317_v19 = vunpack.i.h.bf16 %v1315_v32  ;;  %v1316_v38 = vunpack.i.l.bf16 %v1315_v32  ;;  %v1332_v12 = vunpack.i.h.bf16 %v1330_v34  ;;  %v1331_v13 = vunpack.i.l.bf16 %v1330_v34 }
 0x11f   :  { %v203_v63 = vsel %vm201_vm14, %v1312_v27, %v1927_v50 }
 0x120   :  { %v354_v51 = vsel %vm132_vm8, %v1331_v13, %v1332_v12  ;;  %v356_v52 = vsel %vm132_vm8, %v1316_v38, %v1317_v19  ;;  %v353_v53 = vsel %vm132_vm8, %v1915_v55, %v1331_v13  ;;  %v355_v4 = vsel %vm132_vm8, %v1327_v21, %v1316_v38 }
 0x121   :  { %v1938_v5 = vpop.permute.xlu0 %1319  ;;  %v1940_v32 = vpop.permute.xlu1 %1334  ;;  %v1135_v0 = vpack.c.bf16 %v356_v52, %v354_v51  ;;  %v1137_v37 = vpack.c.bf16 %v355_v4, %v353_v53  ;;  %v265_v19 = vsel %vm70_vm9, %v1261_v54, %v1262_v25  ;;  %v211_v38 = vsel %vm210_vm11, %v1266_v62, %v1267_v26 }
 0x122   :  { %1384 = vrot.lane.b32.xlu0 %v1383_v31, %s1620_s30  ;;  %1399 = vrot.lane.b32.xlu1 %v1398_v22, %s1620_s30  ;;  %v1322_v17 = vunpack.i.h.bf16 %v1938_v5  ;;  %v1321_v21 = vunpack.i.l.bf16 %v1938_v5  ;;  %v1337_v34 = vunpack.i.h.bf16 %v1940_v32  ;;  %v1336_v39 = vunpack.i.l.bf16 %v1940_v32 }
 0x123   :  { %1136 = vmatprep.subr.bf16.mxu0 %v1135_v0  ;;  %v1393_v12 = vpack.i.bf16 %v265_v19, %v191_v16  ;;  %v1413_v13 = vpack.i.bf16 %v211_v38, %v203_v63  ;;  %v273_v51 = vsel %vm189_vm13, %v1850_v61, %v1924_v49  ;;  %v1423_v25 = vpack.i.bf16 %v286_v43, %v281_v15 }
 0x124   :  { %1138 = vmatpush1.bf16.msra.mxu0 %v1137_v37  ;;  %v444_v22 = vsel %vm132_vm8, %v1336_v39, %v1337_v34  ;;  %v446_v31 = vsel %vm132_vm8, %v1321_v21, %v1322_v17  ;;  %v1403_v62 = vpack.i.bf16 %v1256_v58, %v273_v51  ;;  %v202_v61 = vsel %vm201_vm14, %v1311_v9, %v1312_v27  ;;  %v480_v9 = vld [vmem:[%s2297_s2] sm:$0xff] }
 0x125   :  { %v1151_v54 = vpack.c.bf16 %v446_v31, %v444_v22  ;;  %v1408_v52 = vpack.i.bf16 %v202_v61, %v1277_v20  ;;  %v2008_v58 = vpop.permute.xlu0 %431  ;;  %v443_v3 = vsel %vm132_vm8, %v1915_v55, %v1336_v39 }
 0x126   :  { %1394 = vrot.lane.b32.xlu0 %v1393_v12, %s1620_s30  ;;  %1414 = vrot.lane.b32.xlu1 %v1413_v13, %s1620_s30 }
 0x127   :  { %1152 = vmatprep.subr.bf16.mxu1 %v1151_v54 }
 0x12a   :  { %1404 = vrot.lane.b32.xlu0 %v1403_v62, %s1620_s30  ;;  %1424 = vrot.lane.b32.xlu1 %v1423_v25, %s1620_s30 }
 0x12e   :  { %1409 = vrot.lane.b32.xlu0 %v1408_v52, %s1620_s30  ;;  %349 = vrot.lane.b32.xlu1 %v223_v14, %s1620_s30 }
 0x132   :  { %1419 = vrot.lane.b32.xlu0 %v1418_v8, %s1620_s30  ;;  %439 = vrot.lane.b32.xlu1 %v294_v45, %s1620_s30 }
 0x136   :  { %351 = vrot.lane.b32.xlu0 %v224_v57, %s1620_s30  ;;  %347 = vrot.lane.b32.xlu1 %v1848_v60, %s1620_s30 }
 0x13a   :  { %441 = vrot.lane.b32.xlu0 %v295_v28, %s1620_s30  ;;  %483 = vperm.xlu1 %1428, %v480_v9  }
 0x13e   :  { %437 = vrot.lane.b32.xlu0 %v1877_v29, %s1620_s30 }
 0x17c   :  { %v2006_v41 = vpop.permute.xlu1 %1339 }
 0x180   :  { %v2010_v20 = vpop.permute.xlu1 %1349 }
 0x184   :  { %v2012_v60 = vpop.permute.xlu0 %1344  ;;  %v1360_v26 = vpop.permute.xlu1 %1359 }
 0x185   :  { %v1362_v0 = vunpack.i.h.bf16 %v1360_v26  ;;  %v1361_v37 = vunpack.i.l.bf16 %v1360_v26 }
 0x188   :  { %v1355_v27 = vpop.permute.xlu0 %1354  ;;  %v1370_v53 = vpop.permute.xlu1 %1369 }
 0x189   :  { %v1356_v4 = vunpack.i.l.bf16 %v1355_v27  ;;  %v1357_v16 = vunpack.i.h.bf16 %v1355_v27  ;;  %v1372_v51 = vunpack.i.h.bf16 %v1370_v53  ;;  %v1371_v39 = vunpack.i.l.bf16 %v1370_v53 }
 0x18b   :  { %v445_v63 = vsel %vm132_vm8, %v1356_v4, %v1321_v21  ;;  %v358_v38 = vsel %vm132_vm8, %v1357_v16, %v1361_v37 }
 0x18c   :  { %v1365_v5 = vpop.permute.xlu0 %1364  ;;  %v1380_v29 = vpop.permute.xlu1 %1379  ;;  %v1153_v32 = vpack.c.bf16 %v445_v63, %v443_v3 }
 0x18d   :  { %v1366_v17 = vunpack.i.l.bf16 %v1365_v5  ;;  %v1367_v34 = vunpack.i.h.bf16 %v1365_v5  ;;  %v1381_v19 = vunpack.i.l.bf16 %v1380_v29  ;;  %v1382_v54 = vunpack.i.h.bf16 %v1380_v29 }
 0x18e   :  { %1154 = vmatpush1.bf16.msra.mxu1 %v1153_v32  ;;  %v1341_v5 = vunpack.i.l.bf16 %v2006_v41 }
 0x18f   :  { %v360_v12 = vsel %vm132_vm8, %v1362_v0, %v1366_v17  ;;  %v359_v62 = vsel %vm132_vm8, %v1381_v19, %v1362_v0  ;;  %v448_v25 = vsel %vm132_vm8, %v1367_v34, %v1371_v39  ;;  %v447_v47 = vsel %vm132_vm8, %v1382_v54, %v1367_v34 }
 0x190   :  { %v1375_v13 = vpop.permute.xlu0 %1374  ;;  %v1390_v22 = vpop.permute.xlu1 %1389  ;;  %v1139_v31 = vpack.c.bf16 %v360_v12, %v358_v38 }
 0x191   :  { %v1377_v15 = vunpack.i.h.bf16 %v1375_v13  ;;  %v1376_v21 = vunpack.i.l.bf16 %v1375_v13  ;;  %v1392_v27 = vunpack.i.h.bf16 %v1390_v22  ;;  %v1391_v53 = vunpack.i.l.bf16 %v1390_v22 }
 0x192   :  { %1140 = vmatprep.subr.bf16.mxu0 %v1139_v31 }
 0x193   :  { %v357_v43 = vsel %vm132_vm8, %v1377_v15, %v1357_v16  ;;  %v450_v61 = vsel %vm132_vm8, %v1372_v51, %v1376_v21  ;;  %v363_v12 = vsel %vm132_vm8, %v1341_v5, %v1392_v27  ;;  %v1342_v21 = vunpack.i.h.bf16 %v2006_v41 }
 0x194   :  { %v1385_v52 = vpop.permute.xlu0 %1384  ;;  %v1400_v42 = vpop.permute.xlu1 %1399  ;;  %v1141_v14 = vpack.c.bf16 %v359_v62, %v357_v43  ;;  %v1155_v6 = vpack.c.bf16 %v450_v61, %v448_v25  ;;  %v1352_v25 = vunpack.i.h.bf16 %v2010_v20 }
 0x195   :  { %v1386_v8 = vunpack.i.l.bf16 %v1385_v52  ;;  %v1387_v45 = vunpack.i.h.bf16 %v1385_v52  ;;  %v1402_v37 = vunpack.i.h.bf16 %v1400_v42  ;;  %v1401_v17 = vunpack.i.l.bf16 %v1400_v42 }
 0x196   :  { %1142 = vmatpush1.bf16.msra.mxu0 %v1141_v14  ;;  %1156 = vmatprep.subr.bf16.mxu1 %v1155_v6  ;;  %v1347_v42 = vunpack.i.h.bf16 %v2012_v60  ;;  %v1346_v14 = vunpack.i.l.bf16 %v2012_v60 }
 0x197   :  { %v449_v57 = vsel %vm132_vm8, %v1386_v8, %v1372_v51  ;;  %v362_v3 = vsel %vm132_vm8, %v1387_v45, %v1391_v53 }
 0x198   :  { %v1395_v9 = vpop.permute.xlu0 %1394  ;;  %v1415_v28 = vpop.permute.xlu1 %1414  ;;  %v1157_v26 = vpack.c.bf16 %v449_v57, %v447_v47 }
 0x199   :  { %v1396_v4 = vunpack.i.l.bf16 %v1395_v9  ;;  %v1397_v16 = vunpack.i.h.bf16 %v1395_v9  ;;  %v1417_v6 = vunpack.i.h.bf16 %v1415_v28  ;;  %v1416_v47 = vunpack.i.l.bf16 %v1415_v28 }
 0x19a   :  { %1158 = vmatpush1.bf16.msra.mxu1 %v1157_v26 }
 0x19b   :  { %v364_v63 = vsel %vm132_vm8, %v1392_v27, %v1396_v4  ;;  %v452_v13 = vsel %vm132_vm8, %v1397_v16, %v1401_v17  ;;  %v451_v61 = vsel %vm132_vm8, %v1342_v21, %v1397_v16  ;;  %v1351_v27 = vunpack.i.l.bf16 %v2010_v20 }
 0x19c   :  { %v1405_v29 = vpop.permute.xlu0 %1404  ;;  %v1425_v32 = vpop.permute.xlu1 %1424  ;;  %v1143_v0 = vpack.c.bf16 %v364_v63, %v362_v3 }
 0x19d   :  { %v1407_v34 = vunpack.i.h.bf16 %v1405_v29  ;;  %v1406_v19 = vunpack.i.l.bf16 %v1405_v29  ;;  %v1427_v43 = vunpack.i.h.bf16 %v1425_v32  ;;  %v1426_v41 = vunpack.i.l.bf16 %v1425_v32 }
 0x19e   :  { %1144 = vmatprep.subr.bf16.mxu0 %v1143_v0  ;;  %v367_v20 = vsel %vm132_vm8, %v1351_v27, %v1417_v6 }
 0x19f   :  { %v361_v38 = vsel %vm132_vm8, %v1407_v34, %v1387_v45  ;;  %v454_v22 = vsel %vm132_vm8, %v1402_v37, %v1406_v19  ;;  %v458_v53 = vsel %vm132_vm8, %v1427_v43, %v1346_v14  ;;  %v457_v16 = vsel %vm132_vm8, %v2008_v58, %v1427_v43 }
 0x1a0   :  { %v1410_v31 = vpop.permute.xlu0 %1409  ;;  %v350_v51 = vpop.permute.xlu1 %349  ;;  %v1145_v39 = vpack.c.bf16 %v363_v12, %v361_v38  ;;  %v1159_v15 = vpack.c.bf16 %v454_v22, %v452_v13  ;;  %v479_v38 = vld [vmem:[%s2298_s1] sm:$0xff] }
 0x1a1   :  { %v1411_v54 = vunpack.i.l.bf16 %v1410_v31  ;;  %v1412_v62 = vunpack.i.h.bf16 %v1410_v31 }
 0x1a2   :  { %1146 = vmatpush1.bf16.msra.mxu0 %v1145_v39  ;;  %1160 = vmatprep.subr.bf16.mxu1 %v1159_v15 }
 0x1a3   :  { %v453_v52 = vsel %vm132_vm8, %v1411_v54, %v1402_v37  ;;  %v365_v4 = vsel %vm132_vm8, %v1347_v42, %v1412_v62  ;;  %v366_v60 = vsel %vm132_vm8, %v1412_v62, %v1416_v47 }
 0x1a4   :  { %v1420_v8 = vpop.permute.xlu0 %1419  ;;  %v1161_v45 = vpack.c.bf16 %v453_v52, %v451_v61  ;;  %v440_v26 = vpop.permute.xlu1 %439  ;;  %v1149_v37 = vpack.c.bf16 %v367_v20, %v365_v4 }
 0x1a5   :  { %v1422_v57 = vunpack.i.h.bf16 %v1420_v8  ;;  %v1421_v9 = vunpack.i.l.bf16 %v1420_v8 }
 0x1a6   :  { %1162 = vmatpush1.bf16.msra.mxu1 %v1161_v45 }
 0x1a7   :  { %v368_v3 = vsel %vm132_vm8, %v1417_v6, %v1421_v9  ;;  %v456_v28 = vsel %vm132_vm8, %v1422_v57, %v1426_v41  ;;  %v455_v63 = vsel %vm132_vm8, %v1352_v25, %v1422_v57 }
 0x1a8   :  { %v352_v5 = vpop.permute.xlu0 %351  ;;  %v1147_v29 = vpack.c.bf16 %v368_v3, %v366_v60  ;;  %v1163_v32 = vpack.c.bf16 %v458_v53, %v456_v28  ;;  %v1165_v0 = vpack.c.bf16 %v457_v16, %v455_v63  ;;  %v348_v17 = vpop.permute.xlu1 %347 }
 0x1a9   :  { %v370_v58 = vsel %vm132_vm8, %v350_v51, %v352_v5  ;;  %v369_v12 = vsel %vm132_vm8, %v348_v17, %v350_v51 }
 0x1aa   :  { %1148 = vmatprep.subr.bf16.mxu0 %v1147_v29  ;;  %1164 = vmatprep.subr.bf16.mxu1 %v1163_v32 }
 0x1ab   :  { %1150 = vmatpush1.bf16.msra.mxu0 %v1149_v37  ;;  %1166 = vmatpush1.bf16.msra.mxu1 %v1165_v0 }
 0x1ac   :  { %v442_v34 = vpop.permute.xlu0 %441  ;;  %506 = vmatprep.subr.mxu0 %v370_v58 }
 0x1ad   :  { %v460_v19 = vsel %vm132_vm8, %v440_v26, %v442_v34 }
 0x1ae   :  { %577 = vmatprep.subr.mxu1 %v460_v19 }
 0x1af   :  { %507 = vmatpush1.msra.mxu0 %v369_v12 }
 0x1b0   :  { %v438_v13 = vpop.permute.xlu0 %437  ;;  %1129 = vmatmul.mubr.msk.f32.vlgmr.msra.gmra.mrb[0].mxu0 %vm486_vm0, %v479_v38 }
 0x1b1   :  { %v459_v22 = vsel %vm132_vm8, %v438_v13, %v440_v26  ;;  %1032 = vmatprep.mubr.f32.mxu0 %v1615_v1 }
 0x1b2   :  { %578 = vmatpush1.msra.mxu1 %v459_v22 }
 0x1b3   :  { %1130 = vmatmul.mubr.msk.f32.vlgmr.msra.gmra.mrb[0].mxu1 %vm486_vm0, %v479_v38 }
 0x1b4   :  { %1103 = vmatprep.mubr.f32.mxu1 %v1615_v1 }
 0x1b9   :  { %v484_v31 = vpop.permute.xlu1 %483 }
 0x283   :  { %v556_v39 = vpop.f32.mrb[0].mxu0 }
 0x284   :  { %v557_v15 = vadd.f32 %v556_v39, %v484_v31  ;;  %v558_v21 = vpop.f32.mrb[1].mxu0 }
 0x285   :  { %v559_v54 = vadd.f32 %v558_v21, %v484_v31 }
 0x286   :  { %v632_v43 = vmax.f32 %v557_v15, 0.0  ;;  %v627_v51 = vpop.f32.mrb[0].mxu1 }
 0x287   :  { %v633_v62 = vmax.f32 %v559_v54, 0.0  ;;  %v628_v25 = vadd.f32 %v627_v51, %v484_v31  ;;  %v629_v61 = vpop.f32.mrb[1].mxu1 }
 0x288   :  { %v630_v52 = vadd.f32 %v629_v61, %v484_v31  ;;  %v640_v42 = vmul.f32 %v632_v43, %v1718_v36  ;;  %v638_v14 = vmul.f32 %v632_v43, %v1714_v35  ;;  %v642_v6 = vmul.f32 %v1702_v23, %v632_v43 }
 0x289   :  { %v634_v8 = vmax.f32 %v628_v25, 0.0  ;;  %v1429_v45 = vpack.i.bf16 %v633_v62, %v632_v43  ;;  %v641_v47 = vmul.f32 %v1708_v30, %v633_v62  ;;  %v639_v41 = vmul.f32 %v1704_v24, %v633_v62 }
 0x28a   :  { %v635_v1 = vmax.f32 %v630_v52, 0.0  ;;  %v643_v57 = vmul.f32 %v633_v62, %v1737_v48  ;;  %v644_v27 = vmul.f32 %v1711_v33, %v632_v43  ;;  %v645_v53 = vmul.f32 %v633_v62, %v1754_v59 }
 0x28b   :  { %1430 = vrot.lane.b32.xlu0 %v1429_v45, %s1618_s20  ;;  %v711_v9 = vmul.f32 %v634_v8, %v1718_v36  ;;  %v709_v26 = vmul.f32 %v634_v8, %v1714_v35  ;;  %v1459_v16 = vpack.i.bf16 %v641_v47, %v640_v42  ;;  %v1454_v60 = vpack.i.bf16 %v639_v41, %v638_v14 }
 0x28c   :  { %v1434_v4 = vpack.i.bf16 %v635_v1, %v634_v8  ;;  %v712_v3 = vmul.f32 %v1708_v30, %v635_v1  ;;  %v710_v28 = vmul.f32 %v1704_v24, %v635_v1  ;;  %v1474_v63 = vpack.i.bf16 %v643_v57, %v642_v6 }
 0x28d   :  { %v1489_v5 = vpack.i.bf16 %v645_v53, %v644_v27  ;;  %v713_v29 = vmul.f32 %v1702_v23, %v634_v8  ;;  %v714_v36 = vmul.f32 %v635_v1, %v1737_v48  ;;  %v715_v35 = vmul.f32 %v1711_v33, %v634_v8 }
 0x28e   :  { %1435 = vrot.lane.b32.xlu1 %v1434_v4, %s1618_s20  ;;  %v716_v32 = vmul.f32 %v635_v1, %v1754_v59  ;;  %v1469_v20 = vpack.i.bf16 %v712_v3, %v711_v9  ;;  %v1464_v0 = vpack.i.bf16 %v710_v28, %v709_v26  ;;  %v636_v24 = vmul.f32 %v632_v43, %v1787_v18 }
 0x28f   :  { %1440 = vrot.lane.b32.xlu0 %v1429_v45, %s1621_s6  ;;  %v1479_v37 = vpack.i.bf16 %v714_v36, %v713_v29  ;;  %v637_v17 = vmul.f32 %v1771_v7, %v633_v62  ;;  %v707_v58 = vmul.f32 %v634_v8, %v1787_v18  ;;  %v708_v23 = vmul.f32 %v1771_v7, %v635_v1 }
 0x290   :  { %v1494_v30 = vpack.i.bf16 %v716_v32, %v715_v35  ;;  %v646_v59 = vmul.f32 %v1751_v56, %v632_v43  ;;  %v647_v7 = vmul.f32 %v633_v62, %v1781_v11  ;;  %v717_v18 = vmul.f32 %v1751_v56, %v634_v8 }
 0x291   :  { %v1499_v33 = vpack.i.bf16 %v637_v17, %v636_v24  ;;  %v1504_v48 = vpack.i.bf16 %v708_v23, %v707_v58  ;;  %v718_v34 = vmul.f32 %v635_v1, %v1781_v11 }
 0x292   :  { %1450 = vrot.lane.b32.xlu1 %v1429_v45, %s1622_s0 }
 0x293   :  { %1445 = vrot.lane.b32.xlu0 %v1434_v4, %s1621_s6 }
 0x296   :  { %1460 = vrot.lane.b32.xlu1 %v1459_v16, %s1625_s9 }
 0x297   :  { %1455 = vrot.lane.b32.xlu0 %v1454_v60, %s1623_s7 }
 0x29a   :  { %1470 = vrot.lane.b32.xlu1 %v1469_v20, %s1625_s9 }
 0x29b   :  { %1465 = vrot.lane.b32.xlu0 %v1464_v0, %s1623_s7 }
 0x29e   :  { %1475 = vrot.lane.b32.xlu1 %v1474_v63, %s1624_s8 }
 0x29f   :  { %1490 = vrot.lane.b32.xlu0 %v1489_v5, %s1626_s10 }
 0x2a2   :  { %1480 = vrot.lane.b32.xlu1 %v1479_v37, %s1624_s8 }
 0x2a3   :  { %1495 = vrot.lane.b32.xlu0 %v1494_v30, %s1626_s10 }
 0x2a6   :  { %1485 = vrot.lane.b32.xlu1 %v1434_v4, %s1622_s0 }
 0x2a7   :  { %701 = vrot.lane.b32.xlu0 %v646_v59, %s1627_s11 }
 0x2aa   :  { %703 = vrot.lane.b32.xlu1 %v647_v7, %s1627_s11 }
 0x2ab   :  { %772 = vrot.lane.b32.xlu0 %v717_v18, %s1627_s11 }
 0x2ae   :  { %774 = vrot.lane.b32.xlu1 %v718_v34, %s1627_s11 }
 0x2af   :  { %1500 = vrot.lane.b32.xlu0 %v1499_v33, %s1620_s30 }
 0x2b3   :  { %1505 = vrot.lane.b32.xlu0 %v1504_v48, %s1620_s30 }
 0x2fd   :  { %v1431_v19 = vpop.permute.xlu0 %1430 }
 0x2fe   :  { %v1433_v38 = vunpack.i.h.bf16 %v1431_v19  ;;  %v1432_v12 = vunpack.i.l.bf16 %v1431_v19 }
 0x300   :  { %v655_v13 = vsel %vm96_vm5, %v1432_v12, %v1433_v38  ;;  %v1436_v22 = vpop.permute.xlu1 %1435  ;;  %v654_v43 = vsel %vm96_vm5, %v1777_v10, %v1432_v12 }
 0x301   :  { %v1514_v31 = vpack.i.bf16 %v1433_v38, %v655_v13  ;;  %v1438_v56 = vunpack.i.h.bf16 %v1436_v22  ;;  %v1437_v39 = vunpack.i.l.bf16 %v1436_v22  ;;  %v1441_v15 = vpop.permute.xlu0 %1440 }
 0x302   :  { %v1443_v21 = vunpack.i.h.bf16 %v1441_v15  ;;  %v1442_v54 = vunpack.i.l.bf16 %v1441_v15 }
 0x303   :  { %v726_v11 = vsel %vm96_vm5, %v1437_v39, %v1438_v56  ;;  %1515 = vrot.lane.b32.xlu1 %v1514_v31, %s1620_s30  ;;  %v725_v51 = vsel %vm96_vm5, %v1777_v10, %v1437_v39 }
 0x304   :  { %v1519_v62 = vpack.i.bf16 %v1438_v56, %v726_v11  ;;  %v1451_v25 = vpop.permute.xlu1 %1450  ;;  %v1509_v61 = vpack.i.bf16 %v725_v51, %v654_v43  ;;  %v676_v42 = vsel %vm70_vm9, %v1442_v54, %v1443_v21 }
 0x305   :  { %v1446_v52 = vpop.permute.xlu0 %1445  ;;  %v1524_v45 = vpack.i.bf16 %v1443_v21, %v676_v42  ;;  %v1453_v16 = vunpack.i.h.bf16 %v1451_v25  ;;  %v1452_v60 = vunpack.i.l.bf16 %v1451_v25 }
 0x306   :  { %v1448_v14 = vunpack.i.h.bf16 %v1446_v52  ;;  %v1447_v6 = vunpack.i.l.bf16 %v1446_v52  ;;  %1510 = vrot.lane.b32.xlu0 %v1509_v61, %s1620_s30 }
 0x307   :  { %1520 = vrot.lane.b32.xlu1 %v1519_v62, %s1620_s30  ;;  %v697_v37 = vsel %vm210_vm11, %v1452_v60, %v1453_v16  ;;  %v698_v30 = vsel %vm210_vm11, %v1453_v16, %v1855_v2 }
 0x308   :  { %v2113_v8 = vpop.permute.xlu1 %1460  ;;  %v747_v47 = vsel %vm70_vm9, %v1447_v6, %v1448_v14  ;;  %v1544_v33 = vpack.i.bf16 %v698_v30, %v697_v37 }
 0x309   :  { %v1456_v1 = vpop.permute.xlu0 %1455  ;;  %v1529_v41 = vpack.i.bf16 %v1448_v14, %v747_v47  ;;  %v1462_v3 = vunpack.i.l.bf16 %v2113_v8  ;;  %v1463_v56 = vunpack.i.h.bf16 %v2113_v8 }
 0x30a   :  { %v1457_v28 = vunpack.i.l.bf16 %v1456_v1  ;;  %v1458_v29 = vunpack.i.h.bf16 %v1456_v1 }
 0x30b   :  { %1525 = vrot.lane.b32.xlu1 %v1524_v45, %s1620_s30  ;;  %v670_v0 = vsel %vm172_vm10, %v1835_v46, %v1462_v3  ;;  %v671_v25 = vsel %vm172_vm10, %v1462_v3, %v1463_v56 }
 0x30c   :  { %v2117_v10 = vpop.permute.xlu1 %1470  ;;  %v662_v20 = vsel %vm160_vm12, %v1831_v44, %v1457_v28  ;;  %v663_v58 = vsel %vm160_vm12, %v1457_v28, %v1458_v29 }
 0x30d   :  { %v1466_v57 = vpop.permute.xlu0 %1465  ;;  %v1564_v23 = vpack.i.bf16 %v670_v0, %v662_v20  ;;  %v1574_v19 = vpack.i.bf16 %v1458_v29, %v663_v58  ;;  %v1472_v38 = vunpack.i.l.bf16 %v2117_v10  ;;  %v1473_v61 = vunpack.i.h.bf16 %v2117_v10 }
 0x30e   :  { %v1468_v48 = vunpack.i.h.bf16 %v1466_v57  ;;  %v1467_v59 = vunpack.i.l.bf16 %v1466_v57 }
 0x30f   :  { %1530 = vrot.lane.b32.xlu1 %v1529_v41, %s1620_s30  ;;  %v741_v15 = vsel %vm172_vm10, %v1835_v46, %v1472_v38 }
 0x310   :  { %v2120_v9 = vpop.permute.xlu1 %1475  ;;  %v734_v13 = vsel %vm160_vm12, %v1467_v59, %v1468_v48  ;;  %v733_v43 = vsel %vm160_vm12, %v1831_v44, %v1467_v59  ;;  %v1579_v44 = vpack.i.bf16 %v1463_v56, %v671_v25 }
 0x311   :  { %v1477_v26 = vunpack.i.l.bf16 %v2120_v9  ;;  %v1491_v27 = vpop.permute.xlu0 %1490  ;;  %v1569_v62 = vpack.i.bf16 %v741_v15, %v733_v43  ;;  %v1478_v8 = vunpack.i.h.bf16 %v2120_v9 }
 0x312   :  { %v1492_v4 = vunpack.i.l.bf16 %v1491_v27  ;;  %v1493_v22 = vunpack.i.h.bf16 %v1491_v27 }
 0x313   :  { %v1534_v53 = vpack.i.bf16 %v1477_v26, %v1442_v54  ;;  %v683_v47 = vsel %vm189_vm13, %v1477_v26, %v1478_v8 }
 0x314   :  { %v2126_v63 = vpop.permute.xlu1 %1480  ;;  %v1554_v36 = vpack.i.bf16 %v1452_v60, %v1492_v4  ;;  %v692_v21 = vsel %vm201_vm14, %v1493_v22, %v1927_v50  ;;  %v691_v54 = vsel %vm201_vm14, %v1492_v4, %v1493_v22  ;;  %v959_v60 = vld [vmem:[%s2299_s4] sm:$0xff] }
 0x315   :  { %v1482_v5 = vunpack.i.l.bf16 %v2126_v63  ;;  %1535 = vrot.lane.b32.xlu1 %v1534_v53, %s1620_s30  ;;  %v1496_v34 = vpop.permute.xlu0 %1495  ;;  %v1604_v51 = vpack.i.bf16 %v692_v21, %v691_v54  ;;  %v1483_v10 = vunpack.i.h.bf16 %v2126_v63 }
 0x316   :  { %v1497_v31 = vunpack.i.l.bf16 %v1496_v34  ;;  %v1498_v11 = vunpack.i.h.bf16 %v1496_v34 }
 0x317   :  { %v1539_v35 = vpack.i.bf16 %v1482_v5, %v1447_v6  ;;  %v742_v6 = vsel %vm172_vm10, %v1472_v38, %v1473_v61  ;;  %v755_v4 = vsel %vm189_vm13, %v1483_v10, %v1924_v49  ;;  %v754_v9 = vsel %vm189_vm13, %v1482_v5, %v1483_v10 }
 0x318   :  { %v1486_v32 = vpop.permute.xlu1 %1485  ;;  %v763_v46 = vsel %vm201_vm14, %v1498_v11, %v1927_v50  ;;  %v762_v52 = vsel %vm201_vm14, %v1497_v31, %v1498_v11  ;;  %v1589_v1 = vpack.i.bf16 %v1473_v61, %v742_v6  ;;  %v684_v50 = vsel %vm189_vm13, %v1478_v8, %v1924_v49 }
 0x319   :  { %v1488_v24 = vunpack.i.h.bf16 %v1486_v32  ;;  %v1487_v17 = vunpack.i.l.bf16 %v1486_v32  ;;  %1555 = vrot.lane.b32.xlu1 %v1554_v36, %s1620_s30  ;;  %1540 = vrot.lane.b32.xlu0 %v1539_v35, %s1620_s30  ;;  %v1609_v42 = vpack.i.bf16 %v763_v46, %v762_v52  ;;  %v702_v45 = vpop.permute.xlu0 %701  ;;  %v1594_v27 = vpack.i.bf16 %v684_v50, %v683_v47 }
 0x31a   :  { %v1599_v16 = vpack.i.bf16 %v755_v4, %v754_v9 }
 0x31b   :  { %v768_v7 = vsel %vm210_vm11, %v1487_v17, %v1488_v24  ;;  %v769_v18 = vsel %vm210_vm11, %v1488_v24, %v1855_v2  ;;  %v1584_v2 = vpack.i.bf16 %v1468_v48, %v734_v13  ;;  %v1559_v39 = vpack.i.bf16 %v1487_v17, %v1497_v31 }
 0x31c   :  { %v1549_v12 = vpack.i.bf16 %v769_v18, %v768_v7  ;;  %v704_v14 = vpop.permute.xlu1 %703 }
 0x31d   :  { %1565 = vrot.lane.b32.xlu1 %v1564_v23, %s1620_s30  ;;  %1545 = vrot.lane.b32.xlu0 %v1544_v33, %s1620_s30  ;;  %v705_v41 = vsel %vm222_vm15, %v702_v45, %v704_v14  ;;  %v773_v53 = vpop.permute.xlu0 %772  ;;  %v706_v49 = vsel %vm222_vm15, %v704_v14, %v1888_v40 }
 0x320   :  { %v775_v57 = vpop.permute.xlu1 %774 }
 0x321   :  { %1575 = vrot.lane.b32.xlu1 %v1574_v19, %s1620_s30  ;;  %1550 = vrot.lane.b32.xlu0 %v1549_v12, %s1620_s30  ;;  %v776_v26 = vsel %vm222_vm15, %v773_v53, %v775_v57  ;;  %v777_v3 = vsel %vm222_vm15, %v775_v57, %v1888_v40  ;;  %v1501_v28 = vpop.permute.xlu0 %1500 }
 0x322   :  { %v1503_v63 = vunpack.i.h.bf16 %v1501_v28  ;;  %v1502_v5 = vunpack.i.l.bf16 %v1501_v28 }
 0x324   :  { %v833_v30 = vsel %vm132_vm8, %v1502_v5, %v1503_v63  ;;  %v832_v59 = vsel %vm132_vm8, %v1915_v55, %v1502_v5 }
 0x325   :  { %1585 = vrot.lane.b32.xlu1 %v1584_v2, %s1620_s30  ;;  %1560 = vrot.lane.b32.xlu0 %v1559_v39, %s1620_s30  ;;  %v1506_v29 = vpop.permute.xlu0 %1505 }
 0x326   :  { %v1507_v20 = vunpack.i.l.bf16 %v1506_v29  ;;  %v1508_v0 = vunpack.i.h.bf16 %v1506_v29 }
 0x328   :  { %v922_v7 = vsel %vm132_vm8, %v1915_v55, %v1507_v20  ;;  %v923_v38 = vsel %vm132_vm8, %v1507_v20, %v1508_v0 }
 0x329   :  { %1605 = vrot.lane.b32.xlu1 %v1604_v51, %s1620_s30  ;;  %1570 = vrot.lane.b32.xlu0 %v1569_v62, %s1620_s30 }
 0x32d   :  { %1610 = vrot.lane.b32.xlu1 %v1609_v42, %s1620_s30  ;;  %1580 = vrot.lane.b32.xlu0 %v1579_v44, %s1620_s30 }
 0x331   :  { %828 = vrot.lane.b32.xlu1 %v705_v41, %s1620_s30  ;;  %1590 = vrot.lane.b32.xlu0 %v1589_v1, %s1620_s30 }
 0x335   :  { %918 = vrot.lane.b32.xlu1 %v776_v26, %s1620_s30  ;;  %1595 = vrot.lane.b32.xlu0 %v1594_v27, %s1620_s30 }
 0x339   :  { %826 = vrot.lane.b32.xlu1 %v702_v45, %s1620_s30  ;;  %1600 = vrot.lane.b32.xlu0 %v1599_v16, %s1620_s30 }
 0x33d   :  { %962 = vperm.xlu1 %1428, %v959_v60   ;;  %830 = vrot.lane.b32.xlu0 %v706_v49, %s1620_s30 }
 0x341   :  { %920 = vrot.lane.b32.xlu0 %v777_v3, %s1620_s30 }
 0x345   :  { %916 = vrot.lane.b32.xlu0 %v773_v53, %s1620_s30 }
 0x375   :  { %v1516_v36 = vpop.permute.xlu1 %1515 }
 0x376   :  { %v1518_v35 = vunpack.i.h.bf16 %v1516_v36  ;;  %v1517_v32 = vunpack.i.l.bf16 %v1516_v36 }
 0x378   :  { %v1511_v37 = vpop.permute.xlu0 %1510  ;;  %v835_v24 = vsel %vm132_vm8, %v1517_v32, %v1518_v35 }
 0x379   :  { %v1513_v17 = vunpack.i.h.bf16 %v1511_v37  ;;  %v1512_v40 = vunpack.i.l.bf16 %v1511_v37  ;;  %v1521_v58 = vpop.permute.xlu1 %1520  ;;  %v1167_v23 = vpack.c.bf16 %v835_v24, %v833_v30 }
 0x37a   :  { %v1523_v33 = vunpack.i.h.bf16 %v1521_v58  ;;  %v1522_v48 = vunpack.i.l.bf16 %v1521_v58 }
 0x37b   :  { %v834_v18 = vsel %vm132_vm8, %v1512_v40, %v1517_v32  ;;  %1168 = vmatprep.subr.bf16.mxu0 %v1167_v23 }
 0x37c   :  { %v1169_v34 = vpack.c.bf16 %v834_v18, %v832_v59  ;;  %v924_v19 = vsel %vm132_vm8, %v1513_v17, %v1522_v48  ;;  %v925_v12 = vsel %vm132_vm8, %v1522_v48, %v1523_v33 }
 0x37d   :  { %v1185_v13 = vpack.c.bf16 %v924_v19, %v922_v7  ;;  %v1526_v22 = vpop.permute.xlu1 %1525  ;;  %v1183_v31 = vpack.c.bf16 %v925_v12, %v923_v38 }
 0x37e   :  { %1170 = vmatpush1.bf16.msra.mxu0 %v1169_v34  ;;  %v1528_v52 = vunpack.i.h.bf16 %v1526_v22  ;;  %v1527_v44 = vunpack.i.l.bf16 %v1526_v22 }
 0x37f   :  { %1184 = vmatprep.subr.bf16.mxu1 %v1183_v31 }
 0x380   :  { %1186 = vmatpush1.bf16.msra.mxu1 %v1185_v13  ;;  %v841_v16 = vsel %vm132_vm8, %v1527_v44, %v1528_v52 }
 0x381   :  { %v2211_v56 = vpop.permute.xlu1 %1530 }
 0x382   :  { %v1533_v63 = vunpack.i.h.bf16 %v2211_v56  ;;  %v1532_v5 = vunpack.i.l.bf16 %v2211_v56 }
 0x387   :  { %v2213_v2 = vpop.permute.xlu1 %1535 }
 0x388   :  { %v1537_v60 = vunpack.i.l.bf16 %v2213_v2  ;;  %v1538_v23 = vunpack.i.h.bf16 %v2213_v2 }
 0x38a   :  { %v840_v33 = vsel %vm132_vm8, %v1537_v60, %v1527_v44 }
 0x38b   :  { %v2215_v55 = vpop.permute.xlu1 %1555  ;;  %v2217_v39 = vpop.permute.xlu0 %1540 }
 0x38c   :  { %v1558_v7 = vunpack.i.h.bf16 %v2215_v55  ;;  %v1557_v18 = vunpack.i.l.bf16 %v2215_v55  ;;  %v1542_v34 = vunpack.i.l.bf16 %v2217_v39  ;;  %v1543_v31 = vunpack.i.h.bf16 %v2217_v39 }
 0x38d   :  { %v931_v39 = vsel %vm132_vm8, %v1532_v5, %v1533_v63 }
 0x38f   :  { %v1566_v15 = vpop.permute.xlu1 %1565  ;;  %v2219_v21 = vpop.permute.xlu0 %1545 }
 0x390   :  { %v1567_v42 = vunpack.i.l.bf16 %v1566_v15  ;;  %v1568_v6 = vunpack.i.h.bf16 %v1566_v15  ;;  %v1548_v30 = vunpack.i.h.bf16 %v2219_v21  ;;  %v1547_v24 = vunpack.i.l.bf16 %v2219_v21 }
 0x392   :  { %v847_v55 = vsel %vm132_vm8, %v1547_v24, %v1548_v30  ;;  %v846_v44 = vsel %vm132_vm8, %v1558_v7, %v1547_v24 }
 0x393   :  { %v1576_v54 = vpop.permute.xlu1 %1575  ;;  %v2221_v11 = vpop.permute.xlu0 %1550 }
 0x394   :  { %v1578_v61 = vunpack.i.h.bf16 %v1576_v54  ;;  %v1577_v46 = vunpack.i.l.bf16 %v1576_v54  ;;  %v1553_v21 = vunpack.i.h.bf16 %v2221_v11  ;;  %v1552_v54 = vunpack.i.l.bf16 %v2221_v11 }
 0x396   :  { %v836_v50 = vsel %vm132_vm8, %v1567_v42, %v1577_v46  ;;  %v837_v10 = vsel %vm132_vm8, %v1577_v46, %v1578_v61  ;;  %v930_v61 = vsel %vm132_vm8, %v1542_v34, %v1532_v5 }
 0x397   :  { %v1586_v43 = vpop.permute.xlu1 %1585  ;;  %v2223_v51 = vpop.permute.xlu0 %1560 }
 0x398   :  { %v1588_v47 = vunpack.i.h.bf16 %v1586_v43  ;;  %v1587_v41 = vunpack.i.l.bf16 %v1586_v43 }
 0x39a   :  { %v927_v0 = vsel %vm132_vm8, %v1587_v41, %v1588_v47 }
 0x39b   :  { %v2225_v62 = vpop.permute.xlu1 %1605  ;;  %v1571_v25 = vpop.permute.xlu0 %1570 }
 0x39c   :  { %v1572_v57 = vunpack.i.l.bf16 %v1571_v25  ;;  %v1573_v49 = vunpack.i.h.bf16 %v1571_v25  ;;  %v1608_v29 = vunpack.i.h.bf16 %v2225_v62  ;;  %v1607_v36 = vunpack.i.l.bf16 %v2225_v62 }
 0x39e   :  { %v926_v35 = vsel %vm132_vm8, %v1572_v57, %v1587_v41  ;;  %v845_v19 = vsel %vm132_vm8, %v1607_v36, %v1608_v29  ;;  %v844_v46 = vsel %vm132_vm8, %v1557_v18, %v1607_v36 }
 0x39f   :  { %v1581_v14 = vpop.permute.xlu0 %1580  ;;  %v2227_v8 = vpop.permute.xlu1 %1610  ;;  %v1179_v52 = vpack.c.bf16 %v847_v55, %v845_v19  ;;  %v1181_v47 = vpack.c.bf16 %v846_v44, %v844_v46 }
 0x3a0   :  { %v1583_v45 = vunpack.i.h.bf16 %v1581_v14  ;;  %v1582_v1 = vunpack.i.l.bf16 %v1581_v14  ;;  %v1613_v38 = vunpack.i.h.bf16 %v2227_v8  ;;  %v1612_v12 = vunpack.i.l.bf16 %v2227_v8 }
 0x3a1   :  { %v1562_v8 = vunpack.i.l.bf16 %v2223_v51 }
 0x3a2   :  { %v838_v27 = vsel %vm132_vm8, %v1568_v6, %v1582_v1  ;;  %v839_v53 = vsel %vm132_vm8, %v1582_v1, %v1583_v45  ;;  %v935_v11 = vsel %vm132_vm8, %v1612_v12, %v1613_v38  ;;  %v1563_v6 = vunpack.i.h.bf16 %v2223_v51 }
 0x3a3   :  { %v1173_v4 = vpack.c.bf16 %v838_v27, %v836_v50  ;;  %v1591_v9 = vpop.permute.xlu0 %1590  ;;  %v1171_v26 = vpack.c.bf16 %v839_v53, %v837_v10  ;;  %v2240_v32 = vpop.permute.xlu1 %828  ;;  %v937_v10 = vsel %vm132_vm8, %v1552_v54, %v1553_v21  ;;  %v934_v41 = vsel %vm132_vm8, %v1562_v8, %v1612_v12 }
 0x3a4   :  { %v1593_v3 = vunpack.i.h.bf16 %v1591_v9  ;;  %v1592_v28 = vunpack.i.l.bf16 %v1591_v9  ;;  %v1195_v57 = vpack.c.bf16 %v937_v10, %v935_v11 }
 0x3a5   :  { %1172 = vmatprep.subr.bf16.mxu0 %v1171_v26  ;;  %v958_v26 = vld [vmem:[%s2300_s3] sm:$0xff] }
 0x3a6   :  { %v928_v20 = vsel %vm132_vm8, %v1573_v49, %v1592_v28  ;;  %1174 = vmatpush1.bf16.msra.mxu0 %v1173_v4  ;;  %v929_v37 = vsel %vm132_vm8, %v1592_v28, %v1593_v3  ;;  %v936_v4 = vsel %vm132_vm8, %v1563_v6, %v1552_v54 }
 0x3a7   :  { %v1189_v17 = vpack.c.bf16 %v928_v20, %v926_v35  ;;  %v1596_v40 = vpop.permute.xlu0 %1595  ;;  %v1187_v58 = vpack.c.bf16 %v929_v37, %v927_v0  ;;  %v919_v43 = vpop.permute.xlu1 %918  ;;  %v1197_v9 = vpack.c.bf16 %v936_v4, %v934_v41 }
 0x3a8   :  { %v1598_v48 = vunpack.i.h.bf16 %v1596_v40  ;;  %v1597_v59 = vunpack.i.l.bf16 %v1596_v40 }
 0x3a9   :  { %1188 = vmatprep.subr.bf16.mxu1 %v1187_v58 }
 0x3aa   :  { %v842_v13 = vsel %vm132_vm8, %v1538_v23, %v1597_v59  ;;  %1190 = vmatpush1.bf16.msra.mxu1 %v1189_v17  ;;  %v843_v22 = vsel %vm132_vm8, %v1597_v59, %v1598_v48 }
 0x3ab   :  { %v1177_v56 = vpack.c.bf16 %v842_v13, %v840_v33  ;;  %v1601_v2 = vpop.permute.xlu0 %1600  ;;  %v1175_v15 = vpack.c.bf16 %v843_v22, %v841_v16  ;;  %v827_v27 = vpop.permute.xlu1 %826 }
 0x3ac   :  { %v1603_v62 = vunpack.i.h.bf16 %v1601_v2  ;;  %v1602_v25 = vunpack.i.l.bf16 %v1601_v2  ;;  %v848_v16 = vsel %vm132_vm8, %v827_v27, %v2240_v32 }
 0x3ad   :  { %1176 = vmatprep.subr.bf16.mxu0 %v1175_v15 }
 0x3ae   :  { %v932_v42 = vsel %vm132_vm8, %v1543_v31, %v1602_v25  ;;  %1178 = vmatpush1.bf16.msra.mxu0 %v1177_v56  ;;  %v933_v14 = vsel %vm132_vm8, %v1602_v25, %v1603_v62 }
 0x3af   :  { %v1193_v45 = vpack.c.bf16 %v932_v42, %v930_v61  ;;  %v831_v1 = vpop.permute.xlu0 %830  ;;  %1180 = vmatprep.subr.bf16.mxu0 %v1179_v52  ;;  %v1191_v50 = vpack.c.bf16 %v933_v14, %v931_v39 }
 0x3b0   :  { %v849_v53 = vsel %vm132_vm8, %v2240_v32, %v831_v1 }
 0x3b1   :  { %1192 = vmatprep.subr.bf16.mxu1 %v1191_v50 }
 0x3b2   :  { %1182 = vmatpush1.bf16.msra.mxu0 %v1181_v47  ;;  %1194 = vmatpush1.bf16.msra.mxu1 %v1193_v45 }
 0x3b3   :  { %v921_v51 = vpop.permute.xlu0 %920  ;;  %984 = vmatprep.subr.mxu0 %v849_v53  ;;  %1196 = vmatprep.subr.bf16.mxu1 %v1195_v57 }
 0x3b4   :  { %v939_v60 = vsel %vm132_vm8, %v919_v43, %v921_v51 }
 0x3b6   :  { %985 = vmatpush1.msra.mxu0 %v848_v16  ;;  %1198 = vmatpush1.bf16.msra.mxu1 %v1197_v9 }
 0x3b7   :  { %v917_v49 = vpop.permute.xlu0 %916  ;;  %1131 = vmatmul.mubr.msk.f32.vlgmr.msra.gmra.mrb[2].mxu0 %vm486_vm0, %v958_v26  ;;  %1055 = vmatprep.subr.mxu1 %v939_v60 }
 0x3b8   :  { %v938_v3 = vsel %vm132_vm8, %v917_v49, %v919_v43 }
 0x3ba   :  { %1056 = vmatpush1.msra.mxu1 %v938_v3 }
 0x3bb   :  { %1132 = vmatmul.mubr.msk.f32.vlgmr.msra.gmra.mrb[2].mxu1 %vm486_vm0, %v958_v26 }
 0x3bc   :  { %v963_v28 = vpop.permute.xlu1 %962 }
 0x48a   :  { %v1034_v63 = vpop.f32.mrb[2].mxu0 }
 0x48b   :  { %v1035_v5 = vadd.f32 %v1034_v63, %v963_v28  ;;  %v1036_v29 = vpop.f32.mrb[3].mxu0 }
 0x48c   :  { %v1037_v36 = vadd.f32 %v1036_v29, %v963_v28 }
 0x48d   :  { %v1110_v35 = vmax.f32 %v1035_v5, 0.0 }
 0x48e   :  { %v1111_v32 = vmax.f32 %v1037_v36, 0.0  ;;  %v1105_v20 = vpop.f32.mrb[2].mxu1 }
 0x48f   :  { %1114 = vst [vmem:[%s2301_s5] sm:$0xff] %v1110_v35  ;;  %v1106_v0 = vadd.f32 %v1105_v20, %v963_v28  ;;  %v1107_v37 = vpop.f32.mrb[3].mxu1 }
 0x490   :  { %1115 = vst [vmem:[%s2301_s5 + $0x8] sm:$0xff] %v1111_v32  ;;  %v1108_v30 = vadd.f32 %v1107_v37, %v963_v28 }
 0x491   :  { %v1112_v24 = vmax.f32 %v1106_v0, 0.0 }
 0x492   :  { %v1113_v17 = vmax.f32 %v1108_v30, 0.0 }
 0x493   :  { %1133 = vst [vmem:[%s2301_s5 + $0x10] sm:$0xff] %v1112_v24 }
 0x494   :  { %1134 = vst [vmem:[%s2301_s5 + $0x18] sm:$0xff] %v1113_v17 }

</bundles_post_ra>
